<compile_context>
chip_gen: v7x
topology: tpu7x:2x2x1
jax: 0.10.0
libtpu: 0.0.40
codegen_flags: <defaults>
</compile_context>

<pallas_src>
import numpy as np
import jax
import jax.numpy as jnp
from jax.experimental import pallas as pl
from jax.experimental.pallas import tpu as pltpu


def _round_up(x, m):
    return ((x + m - 1) // m) * m


def _gelu(x):
    # TODO(synk): nn.GELU() default is the exact erf GELU; the tanh
    # approximation (<= ~1e-3 abs deviation) is used so the transcendental
    # rides the otherwise-idle EUP slot.
    return 0.5 * x * (1.0 + jnp.tanh(x * (0.7978845608028654
                                          + 0.035677408136300125 * x * x)))


def _instance_norm(x, gamma, beta, eps=1e-5):
    # x: (nb, HW, C).  nn.InstanceNorm2d(affine=True) forward with *instance*
    # statistics (training-mode behaviour).  Single-pass stats (biased
    # variance) and folded affine: per-element cost is one mul + one add.
    m = jnp.mean(x, axis=1, keepdims=True)
    m2 = jnp.mean(x * x, axis=1, keepdims=True)
    var = jnp.maximum(m2 - m * m, 0.0)
    a = gamma * jax.lax.rsqrt(var + eps)           # (nb, 1, C)
    b = beta - m * a                               # (nb, 1, C)
    return x * a + b


def squeeze_excitation_bottleneck(x_nchw, params, kernel_size, feature_size,
                                  block_n=None):
    """Forward pass of SqueezeExcitationBottleneck.

    x_nchw: (N, Cin, H, W) f32.  Returns (N, Cout, H, W) f32,
    Cout = out_planes + dense_depth.
    """
    N, cin, H, W = x_nchw.shape
    assert H == feature_size and W == feature_size, "AvgPool must reduce spatial to 1x1"
    K = kernel_size
    p = (K - 1) // 2
    KK = K * K
    HW = H * W
    cp = params["w1"].shape[1]
    cout = params["w2"].shape[1]
    cp_pad = _round_up(cp, 128)
    cout_pad = _round_up(cout, 128)
    cmax = max(cp_pad, cout_pad)

    # ---------------- pack parameters (lane-padded; matmul weights bf16) ----
    def pad2d(a, rows, cols):
        return jnp.pad(a, ((0, rows - a.shape[0]), (0, cols - a.shape[1])))

    w1 = pad2d(params["w1"], cin, cp_pad).astype(jnp.bfloat16)        # (cin, Cp)
    w2 = pad2d(params["w2"], cp_pad, cout_pad).astype(jnp.bfloat16)   # (Cp, Co)
    ws1 = pad2d(params["ws1"], cout_pad, cp_pad).astype(jnp.bfloat16)
    ws2 = pad2d(params["ws2"], cp_pad, cout_pad).astype(jnp.bfloat16)

    def padv(a):
        return pad2d(a, a.shape[0], cmax)

    # NOTE: conv biases b1 / bdw / b2 are intentionally NOT packed or applied:
    # each feeds directly into an InstanceNorm that uses instance statistics,
    # so the per-channel constant cancels exactly (mathematically dead work).
    vec = jnp.concatenate(
        [padv(params["g1"]), padv(params["be1"]),
         padv(params["wdw"]),
         padv(params["g2"]), padv(params["be2"]),
         padv(params["g3"]), padv(params["be3"]),
         padv(params["bs1"]), padv(params["bs2"])],
        axis=0).astype(jnp.float32)
    R_G1, R_BE1, R_WDW = 0, 1, 2
    R_G2, R_BE2 = 2 + KK, 3 + KK
    R_G3, R_BE3 = 4 + KK, 5 + KK
    R_BS1, R_BS2 = 6 + KK, 7 + KK

    # ---------------- choose samples per grid step ---------------------------
    if block_n is None:
        # Live VMEM per extra sample: reflect-pad scratch + ~8 live f32
        # activation tiles + double-buffered input/output blocks.
        per_sample = ((H + 2 * p) * (W + 2 * p) * cp_pad * 4
                      + 8 * HW * cmax * 4
                      + 2 * HW * cin * 4 + 2 * HW * cout * 4)
        budget = 32 << 20                      # well inside v7x's 64 MiB / TC
        cap = max(1, budget // max(per_sample, 1))
        try:
            kind = jax.devices()[0].device_kind.lower()
        except Exception:
            kind = ""
        two_tc = ("v7" in kind) or ("7x" in kind)
        divs = [d for d in range(1, N + 1) if N % d == 0 and d <= cap]
        block_n = max(divs)                    # single-TC (v5e/v6e): fattest step
        if two_tc:
            # v7x: 2 TensorCores share the "parallel" axis -> prefer an even
            # (>= 2) number of grid steps so both cores get equal work.
            pref = [d for d in divs if (N // d) % 2 == 0]
            if pref:
                block_n = max(pref)
    assert N % block_n == 0
    grid = (N // block_n,)

    # ---------------- the kernel ---------------------------------------------
    def kernel(x_ref, vec_ref, w1_ref, w2_ref, ws1_ref, ws2_ref, o_ref, pad_ref):
        nb = x_ref.shape[0]
        v = vec_ref[...]
        g1 = v[R_G1:R_G1 + 1, :cp_pad]
        be1 = v[R_BE1:R_BE1 + 1, :cp_pad]
        wdw = v[R_WDW:R_WDW + KK, :cp_pad]
        g2 = v[R_G2:R_G2 + 1, :cp_pad]
        be2 = v[R_BE2:R_BE2 + 1, :cp_pad]
        g3 = v[R_G3:R_G3 + 1, :cout_pad]
        be3 = v[R_BE3:R_BE3 + 1, :cout_pad]
        bs1 = v[R_BS1:R_BS1 + 1, :cp_pad]
        bs2 = v[R_BS2:R_BS2 + 1, :cout_pad]

        # --- 1x1 conv -> InstanceNorm -> GELU (bf16 MXU, f32 accumulate) ----
        x = x_ref[...].astype(jnp.bfloat16).reshape(nb * HW, cin)
        y = jnp.dot(x, w1_ref[...], preferred_element_type=jnp.float32)
        y = _gelu(_instance_norm(y.reshape(nb, HW, cp_pad), g1, be1))  # (nb,HW,Cp)

        # --- depthwise KxK conv, reflect padding via VMEM scratch -----------
        y4 = y.reshape(nb, H, W, cp_pad)
        if p > 0:
            pad_ref[:, p:p + H, p:p + W, :] = y4
            for j in range(1, p + 1):                  # reflect rows (H axis)
                pad_ref[:, p - j:p - j + 1, p:p + W, :] = \
                    pad_ref[:, p + j:p + j + 1, p:p + W, :]
                pad_ref[:, p + H - 1 + j:p + H + j, p:p + W, :] = \
                    pad_ref[:, p + H - 1 - j:p + H - j, p:p + W, :]
            for j in range(1, p + 1):                  # reflect cols (W axis)
                pad_ref[:, :, p - j:p - j + 1, :] = \
                    pad_ref[:, :, p + j:p + j + 1, :]
                pad_ref[:, :, p + W - 1 + j:p + W + j, :] = \
                    pad_ref[:, :, p + W - 1 - j:p + W - j, :]
            # first tap initialises the accumulator (no zeros tile + add)
            z = pad_ref[:, 0:H, 0:W, :] * wdw[0:1, :]
            for dy in range(K):
                for dx in range(K):
                    if dy == 0 and dx == 0:
                        continue
                    t = dy * K + dx
                    z = z + pad_ref[:, dy:dy + H, dx:dx + W, :] * wdw[t:t + 1, :]
        else:
            z = y4 * wdw[0:1, :]
        z = _gelu(_instance_norm(z.reshape(nb, HW, cp_pad), g2, be2))  # (nb,HW,Cp)

        # --- 1x1 conv -> InstanceNorm ----------------------------------------
        o = jnp.dot(z.reshape(nb * HW, cp_pad).astype(jnp.bfloat16), w2_ref[...],
                    preferred_element_type=jnp.float32)
        o = _instance_norm(o.reshape(nb, HW, cout_pad), g3, be3)       # (nb,HW,Co)

        # --- squeeze-excitation: avgpool -> 1x1 -> GELU -> 1x1 -> sigmoid ----
        m = jnp.mean(o, axis=1)                                        # (nb, Co)
        s = _gelu(jnp.dot(m.astype(jnp.bfloat16), ws1_ref[...],
                          preferred_element_type=jnp.float32) + bs1)
        s = jax.nn.sigmoid(jnp.dot(s.astype(jnp.bfloat16), ws2_ref[...],
                                   preferred_element_type=jnp.float32) + bs2)

        out = o * s[:, None, :]                                        # (nb,HW,Co)

        # --- store unpadded, channel-major (block_n, cout, HW) ---------------
        # Per-sample 2-D XLU transpose + sublane slice: no 4x lane-padded HBM
        # write, no wrapper-side slice / transpose.
        for b in range(nb):
            o_ref[b] = out[b].T[:cout, :].astype(o_ref.dtype)

    # ---------------- launch --------------------------------------------------
    # Only non-free wrapper op: the tiny cin-channel input transpose.
    x_in = jnp.transpose(x_nchw, (0, 2, 3, 1)).reshape(N, HW, cin).astype(jnp.float32)

    flops = (2 * N * HW * (cin * cp + cp * cout)       # the two 1x1 convs
             + 2 * N * HW * KK * cp                    # depthwise conv
             + 2 * N * (cout * cp + cp * cout))        # SE 1x1 convs
    transcendentals = N * HW * cp * 2 + N * (cp + cout)
    bytes_accessed = int(x_in.size * 4 + N * cout * HW * 4 + vec.size * 4
                         + (w1.size + w2.size + ws1.size + ws2.size) * 2)

    out = pl.pallas_call(
        kernel,
        out_shape=jax.ShapeDtypeStruct((N, cout, HW), jnp.float32),
        grid=grid,
        in_specs=[
            pl.BlockSpec((block_n, HW, cin), lambda n: (n, 0, 0)),
            pl.BlockSpec(vec.shape, lambda n: (0, 0)),
            pl.BlockSpec(w1.shape, lambda n: (0, 0)),
            pl.BlockSpec(w2.shape, lambda n: (0, 0)),
            pl.BlockSpec(ws1.shape, lambda n: (0, 0)),
            pl.BlockSpec(ws2.shape, lambda n: (0, 0)),
        ],
        out_specs=pl.BlockSpec((block_n, cout, HW), lambda n: (n, 0, 0)),
        scratch_shapes=[pltpu.VMEM((block_n, H + 2 * p, W + 2 * p, cp_pad),
                                   jnp.float32)],
        compiler_params=pltpu.CompilerParams(
            dimension_semantics=("parallel",),
            vmem_limit_bytes=48 * 1024 * 1024),
        cost_estimate=pl.CostEstimate(flops=flops,
                                      transcendentals=transcendentals,
                                      bytes_accessed=bytes_accessed),
    )(x_in, vec, w1, w2, ws1, ws2)

    # (N, Cout, HW) -> (N, Cout, H, W): contiguous reshape, effectively free.
    return out.reshape(N, cout, H, W)


def init_params(key, last_planes, in_planes, out_planes, dense_depth, kernel_size):
    cout = out_planes + dense_depth
    kk = kernel_size * kernel_size
    ks = jax.random.split(key, 20)

    def w(k, shape, fan_in):
        return jax.random.normal(k, shape, jnp.float32) / np.sqrt(float(fan_in))

    def b(k, c):
        return 0.01 * jax.random.normal(k, (1, c), jnp.float32)

    def gamma(k, c):
        return 1.0 + 0.05 * jax.random.normal(k, (1, c), jnp.float32)

    def beta(k, c):
        return 0.05 * jax.random.normal(k, (1, c), jnp.float32)

    return dict(
        # conv 1x1 (last_planes -> in_planes) + IN   (b1 cancels in the IN)
        w1=w(ks[0], (last_planes, in_planes), last_planes), b1=b(ks[1], in_planes),
        g1=gamma(ks[2], in_planes), be1=beta(ks[3], in_planes),
        # depthwise KxK conv (row t = dy*K + dx) + IN (bdw cancels in the IN)
        wdw=w(ks[4], (kk, in_planes), kk), bdw=b(ks[5], in_planes),
        g2=gamma(ks[6], in_planes), be2=beta(ks[7], in_planes),
        # conv 1x1 (in_planes -> out_planes + dense_depth) + IN (b2 cancels)
        w2=w(ks[8], (in_planes, cout), in_planes), b2=b(ks[9], cout),
        g3=gamma(ks[10], cout), be3=beta(ks[11], cout),
        # SE: 1x1 (cout -> in_planes), 1x1 (in_planes -> cout)
        ws1=w(ks[12], (cout, in_planes), cout), bs1=b(ks[13], in_planes),
        ws2=w(ks[14], (in_planes, cout), in_planes), bs2=b(ks[15], cout),
    )


if __name__ == "__main__":
    # Small shapes consistent with the module's forward.
    N = 2
    last_planes = 8      # input channels
    in_planes = 16       # bottleneck width
    out_planes = 24
    dense_depth = 8      # output channels = 32
    kernel_size = 3
    feature_size = 8     # H = W = feature_size (AvgPool -> 1x1)

    key = jax.random.PRNGKey(0)
    k_par, k_x = jax.random.split(key)
    params = init_params(k_par, last_planes, in_planes, out_planes,
                         dense_depth, kernel_size)
    x = jax.random.normal(k_x, (N, last_planes, feature_size, feature_size),
                          jnp.float32)

    out = squeeze_excitation_bottleneck(x, params, kernel_size, feature_size)
    out = jax.block_until_ready(out)

    assert out.shape == (N, out_planes + dense_depth, feature_size, feature_size)
    assert bool(jnp.all(jnp.isfinite(out)))
    print("KERNEL_OK")
</pallas_src>

<mosaic_0001>
module attributes {stable_mosaic.version = 11 : i64} {
  func.func @kernel(%arg0: i32, %arg1: memref<2x64x8xf32, #tpu.memory_space<vmem>>, %arg2: memref<17x128xf32, #tpu.memory_space<vmem>>, %arg3: memref<8x128xbf16, #tpu.memory_space<vmem>>, %arg4: memref<128x128xbf16, #tpu.memory_space<vmem>>, %arg5: memref<128x128xbf16, #tpu.memory_space<vmem>>, %arg6: memref<128x128xbf16, #tpu.memory_space<vmem>>, %arg7: memref<2x32x64xf32, #tpu.memory_space<vmem>>, %arg8: memref<2x10x10x128xf32, #tpu.memory_space<vmem>>) attributes {dimension_semantics = [#tpu.dimension_semantics<parallel>], iteration_bounds = array<i64: 1>, scalar_prefetch = 0 : i64, scratch_operands = 1 : i64, tpu.core_type = #tpu.core_type<tc>, window_params = [{transform_indices = @transform_0, window_bounds = array<i64: 2, 64, 8>}, {pipeline_mode = #tpu.pipeline_mode<synchronous>, transform_indices = @transform_1, window_bounds = array<i64: 17, 128>}, {pipeline_mode = #tpu.pipeline_mode<synchronous>, transform_indices = @transform_2, window_bounds = array<i64: 8, 128>}, {pipeline_mode = #tpu.pipeline_mode<synchronous>, transform_indices = @transform_3, window_bounds = array<i64: 128, 128>}, {pipeline_mode = #tpu.pipeline_mode<synchronous>, transform_indices = @transform_4, window_bounds = array<i64: 128, 128>}, {pipeline_mode = #tpu.pipeline_mode<synchronous>, transform_indices = @transform_5, window_bounds = array<i64: 128, 128>}, {transform_indices = @transform_6, window_bounds = array<i64: 2, 32, 64>}]} {
    %c0 = arith.constant 0 : index
    %c0_0 = arith.constant 0 : index
    %0 = vector.load %arg2[%c0, %c0_0] : memref<17x128xf32, #tpu.memory_space<vmem>>, vector<17x128xf32>
    %1 = vector.extract_strided_slice %0 {offsets = [0, 0], sizes = [1, 128], strides = [1, 1]} : vector<17x128xf32> to vector<1x128xf32>
    %2 = vector.extract_strided_slice %0 {offsets = [1, 0], sizes = [1, 128], strides = [1, 1]} : vector<17x128xf32> to vector<1x128xf32>
    %3 = vector.extract_strided_slice %0 {offsets = [2, 0], sizes = [9, 128], strides = [1, 1]} : vector<17x128xf32> to vector<9x128xf32>
    %4 = vector.extract_strided_slice %0 {offsets = [11, 0], sizes = [1, 128], strides = [1, 1]} : vector<17x128xf32> to vector<1x128xf32>
    %5 = vector.extract_strided_slice %0 {offsets = [12, 0], sizes = [1, 128], strides = [1, 1]} : vector<17x128xf32> to vector<1x128xf32>
    %6 = vector.extract_strided_slice %0 {offsets = [13, 0], sizes = [1, 128], strides = [1, 1]} : vector<17x128xf32> to vector<1x128xf32>
    %7 = vector.extract_strided_slice %0 {offsets = [14, 0], sizes = [1, 128], strides = [1, 1]} : vector<17x128xf32> to vector<1x128xf32>
    %8 = vector.extract_strided_slice %0 {offsets = [15, 0], sizes = [1, 128], strides = [1, 1]} : vector<17x128xf32> to vector<1x128xf32>
    %9 = vector.extract_strided_slice %0 {offsets = [16, 0], sizes = [1, 128], strides = [1, 1]} : vector<17x128xf32> to vector<1x128xf32>
    %c0_1 = arith.constant 0 : index
    %c0_2 = arith.constant 0 : index
    %c0_3 = arith.constant 0 : index
    %10 = vector.load %arg1[%c0_1, %c0_2, %c0_3] : memref<2x64x8xf32, #tpu.memory_space<vmem>>, vector<2x64x8xf32>
    %11 = arith.truncf %10 : vector<2x64x8xf32> to vector<2x64x8xbf16>
    %12 = vector.shape_cast %11 : vector<2x64x8xbf16> to vector<128x8xbf16>
    %c0_4 = arith.constant 0 : index
    %c0_5 = arith.constant 0 : index
    %13 = vector.load %arg3[%c0_4, %c0_5] : memref<8x128xbf16, #tpu.memory_space<vmem>>, vector<8x128xbf16>
    %cst = arith.constant dense<0.000000e+00> : vector<128x128xf32>
    %14 = tpu.matmul %12, %13, %cst {dimension_numbers = #tpu.dot_dimension_numbers<[1], [0], [0], [1], [0, 0, 1, 1], [], []>} : vector<128x8xbf16>, vector<8x128xbf16>, vector<128x128xf32> -> vector<128x128xf32>
    %15 = vector.shape_cast %14 : vector<128x128xf32> to vector<2x64x128xf32>
    %cst_6 = arith.constant dense<0.000000e+00> : vector<2x128xf32>
    %16 = vector.multi_reduction <add>, %15, %cst_6 [1] : vector<2x64x128xf32> to vector<2x128xf32>
    %17 = vector.shape_cast %16 : vector<2x128xf32> to vector<2x1x128xf32>
    %cst_7 = arith.constant 6.400000e+01 : f32
    %18 = vector.broadcast %cst_7 : f32 to vector<2x1x128xf32>
    %19 = arith.divf %17, %18 : vector<2x1x128xf32>
    %20 = arith.mulf %15, %15 : vector<2x64x128xf32>
    %cst_8 = arith.constant dense<0.000000e+00> : vector<2x128xf32>
    %21 = vector.multi_reduction <add>, %20, %cst_8 [1] : vector<2x64x128xf32> to vector<2x128xf32>
    %22 = vector.shape_cast %21 : vector<2x128xf32> to vector<2x1x128xf32>
    %cst_9 = arith.constant 6.400000e+01 : f32
    %23 = vector.broadcast %cst_9 : f32 to vector<2x1x128xf32>
    %24 = arith.divf %22, %23 : vector<2x1x128xf32>
    %25 = arith.mulf %19, %19 : vector<2x1x128xf32>
    %26 = arith.subf %24, %25 : vector<2x1x128xf32>
    %cst_10 = arith.constant 0.000000e+00 : f32
    %27 = vector.broadcast %cst_10 : f32 to vector<2x1x128xf32>
    %28 = arith.maximumf %26, %27 : vector<2x1x128xf32>
    %cst_11 = arith.constant 9.99999974E-6 : f32
    %29 = vector.broadcast %cst_11 : f32 to vector<2x1x128xf32>
    %30 = arith.addf %28, %29 : vector<2x1x128xf32>
    %31 = math.rsqrt %30 : vector<2x1x128xf32>
    %32 = vector.shape_cast %1 : vector<1x128xf32> to vector<1x1x128xf32>
    %33 = vector.broadcast %32 : vector<1x1x128xf32> to vector<2x1x128xf32>
    %34 = arith.mulf %33, %31 : vector<2x1x128xf32>
    %35 = arith.mulf %19, %34 : vector<2x1x128xf32>
    %36 = vector.shape_cast %2 : vector<1x128xf32> to vector<1x1x128xf32>
    %37 = vector.broadcast %36 : vector<1x1x128xf32> to vector<2x1x128xf32>
    %38 = arith.subf %37, %35 : vector<2x1x128xf32>
    %39 = vector.broadcast %34 : vector<2x1x128xf32> to vector<2x64x128xf32>
    %40 = arith.mulf %15, %39 : vector<2x64x128xf32>
    %41 = vector.broadcast %38 : vector<2x1x128xf32> to vector<2x64x128xf32>
    %42 = arith.addf %40, %41 : vector<2x64x128xf32>
    %cst_12 = arith.constant 5.000000e-01 : f32
    %43 = vector.broadcast %cst_12 : f32 to vector<2x64x128xf32>
    %44 = arith.mulf %43, %42 : vector<2x64x128xf32>
    %cst_13 = arith.constant 0.0356774069 : f32
    %45 = vector.broadcast %cst_13 : f32 to vector<2x64x128xf32>
    %46 = arith.mulf %45, %42 : vector<2x64x128xf32>
    %47 = arith.mulf %46, %42 : vector<2x64x128xf32>
    %cst_14 = arith.constant 0.797884583 : f32
    %48 = vector.broadcast %cst_14 : f32 to vector<2x64x128xf32>
    %49 = arith.addf %48, %47 : vector<2x64x128xf32>
    %50 = arith.mulf %42, %49 : vector<2x64x128xf32>
    %51 = math.tanh %50 : vector<2x64x128xf32>
    %cst_15 = arith.constant 1.000000e+00 : f32
    %52 = vector.broadcast %cst_15 : f32 to vector<2x64x128xf32>
    %53 = arith.addf %52, %51 : vector<2x64x128xf32>
    %54 = arith.mulf %44, %53 : vector<2x64x128xf32>
    %55 = vector.shape_cast %54 : vector<2x64x128xf32> to vector<2x8x8x128xf32>
    %c0_16 = arith.constant 0 : index
    %c1 = arith.constant 1 : index
    %c1_17 = arith.constant 1 : index
    %c0_18 = arith.constant 0 : index
    %56 = vector.load %arg8[%c0_16, %c1, %c1_17, %c0_18] : memref<2x10x10x128xf32, #tpu.memory_space<vmem>>, vector<2x8x8x128xf32>
    tpu.vector_store %arg8[%c0_16, %c1, %c1_17, %c0_18], %55 {strides = array<i32>} : memref<2x10x10x128xf32, #tpu.memory_space<vmem>>, vector<2x8x8x128xf32>,
    %c0_19 = arith.constant 0 : index
    %c2 = arith.constant 2 : index
    %c1_20 = arith.constant 1 : index
    %c0_21 = arith.constant 0 : index
    %57 = vector.load %arg8[%c0_19, %c2, %c1_20, %c0_21] : memref<2x10x10x128xf32, #tpu.memory_space<vmem>>, vector<2x1x8x128xf32>
    %c0_22 = arith.constant 0 : index
    %c0_23 = arith.constant 0 : index
    %c1_24 = arith.constant 1 : index
    %c0_25 = arith.constant 0 : index
    %58 = vector.load %arg8[%c0_22, %c0_23, %c1_24, %c0_25] : memref<2x10x10x128xf32, #tpu.memory_space<vmem>>, vector<2x1x8x128xf32>
    tpu.vector_store %arg8[%c0_22, %c0_23, %c1_24, %c0_25], %57 {strides = array<i32>} : memref<2x10x10x128xf32, #tpu.memory_space<vmem>>, vector<2x1x8x128xf32>,
    %c0_26 = arith.constant 0 : index
    %c7 = arith.constant 7 : index
    %c1_27 = arith.constant 1 : index
    %c0_28 = arith.constant 0 : index
    %59 = vector.load %arg8[%c0_26, %c7, %c1_27, %c0_28] : memref<2x10x10x128xf32, #tpu.memory_space<vmem>>, vector<2x1x8x128xf32>
    %c0_29 = arith.constant 0 : index
    %c9 = arith.constant 9 : index
    %c1_30 = arith.constant 1 : index
    %c0_31 = arith.constant 0 : index
    %60 = vector.load %arg8[%c0_29, %c9, %c1_30, %c0_31] : memref<2x10x10x128xf32, #tpu.memory_space<vmem>>, vector<2x1x8x128xf32>
    tpu.vector_store %arg8[%c0_29, %c9, %c1_30, %c0_31], %59 {strides = array<i32>} : memref<2x10x10x128xf32, #tpu.memory_space<vmem>>, vector<2x1x8x128xf32>,
    %c0_32 = arith.constant 0 : index
    %c0_33 = arith.constant 0 : index
    %c2_34 = arith.constant 2 : index
    %c0_35 = arith.constant 0 : index
    %61 = vector.load %arg8[%c0_32, %c0_33, %c2_34, %c0_35] : memref<2x10x10x128xf32, #tpu.memory_space<vmem>>, vector<2x10x1x128xf32>
    %c0_36 = arith.constant 0 : index
    %c0_37 = arith.constant 0 : index
    %c0_38 = arith.constant 0 : index
    %c0_39 = arith.constant 0 : index
    %62 = vector.load %arg8[%c0_36, %c0_37, %c0_38, %c0_39] : memref<2x10x10x128xf32, #tpu.memory_space<vmem>>, vector<2x10x1x128xf32>
    tpu.vector_store %arg8[%c0_36, %c0_37, %c0_38, %c0_39], %61 {strides = array<i32>} : memref<2x10x10x128xf32, #tpu.memory_space<vmem>>, vector<2x10x1x128xf32>,
    %c0_40 = arith.constant 0 : index
    %c0_41 = arith.constant 0 : index
    %c7_42 = arith.constant 7 : index
    %c0_43 = arith.constant 0 : index
    %63 = vector.load %arg8[%c0_40, %c0_41, %c7_42, %c0_43] : memref<2x10x10x128xf32, #tpu.memory_space<vmem>>, vector<2x10x1x128xf32>
    %c0_44 = arith.constant 0 : index
    %c0_45 = arith.constant 0 : index
    %c9_46 = arith.constant 9 : index
    %c0_47 = arith.constant 0 : index
    %64 = vector.load %arg8[%c0_44, %c0_45, %c9_46, %c0_47] : memref<2x10x10x128xf32, #tpu.memory_space<vmem>>, vector<2x10x1x128xf32>
    tpu.vector_store %arg8[%c0_44, %c0_45, %c9_46, %c0_47], %63 {strides = array<i32>} : memref<2x10x10x128xf32, #tpu.memory_space<vmem>>, vector<2x10x1x128xf32>,
    %c0_48 = arith.constant 0 : index
    %c0_49 = arith.constant 0 : index
    %c0_50 = arith.constant 0 : index
    %c0_51 = arith.constant 0 : index
    %65 = vector.load %arg8[%c0_48, %c0_49, %c0_50, %c0_51] : memref<2x10x10x128xf32, #tpu.memory_space<vmem>>, vector<2x8x8x128xf32>
    %66 = vector.extract_strided_slice %3 {offsets = [0, 0], sizes = [1, 128], strides = [1, 1]} : vector<9x128xf32> to vector<1x128xf32>
    %67 = vector.shape_cast %66 : vector<1x128xf32> to vector<1x1x1x128xf32>
    %68 = vector.broadcast %67 : vector<1x1x1x128xf32> to vector<2x8x8x128xf32>
    %69 = arith.mulf %65, %68 : vector<2x8x8x128xf32>
    %c0_52 = arith.constant 0 : index
    %c0_53 = arith.constant 0 : index
    %c1_54 = arith.constant 1 : index
    %c0_55 = arith.constant 0 : index
    %70 = vector.load %arg8[%c0_52, %c0_53, %c1_54, %c0_55] : memref<2x10x10x128xf32, #tpu.memory_space<vmem>>, vector<2x8x8x128xf32>
    %71 = vector.extract_strided_slice %3 {offsets = [1, 0], sizes = [1, 128], strides = [1, 1]} : vector<9x128xf32> to vector<1x128xf32>
    %72 = vector.shape_cast %71 : vector<1x128xf32> to vector<1x1x1x128xf32>
    %73 = vector.broadcast %72 : vector<1x1x1x128xf32> to vector<2x8x8x128xf32>
    %74 = arith.mulf %70, %73 : vector<2x8x8x128xf32>
    %75 = arith.addf %69, %74 : vector<2x8x8x128xf32>
    %c0_56 = arith.constant 0 : index
    %c0_57 = arith.constant 0 : index
    %c2_58 = arith.constant 2 : index
    %c0_59 = arith.constant 0 : index
    %76 = vector.load %arg8[%c0_56, %c0_57, %c2_58, %c0_59] : memref<2x10x10x128xf32, #tpu.memory_space<vmem>>, vector<2x8x8x128xf32>
    %77 = vector.extract_strided_slice %3 {offsets = [2, 0], sizes = [1, 128], strides = [1, 1]} : vector<9x128xf32> to vector<1x128xf32>
    %78 = vector.shape_cast %77 : vector<1x128xf32> to vector<1x1x1x128xf32>
    %79 = vector.broadcast %78 : vector<1x1x1x128xf32> to vector<2x8x8x128xf32>
    %80 = arith.mulf %76, %79 : vector<2x8x8x128xf32>
    %81 = arith.addf %75, %80 : vector<2x8x8x128xf32>
    %c0_60 = arith.constant 0 : index
    %c1_61 = arith.constant 1 : index
    %c0_62 = arith.constant 0 : index
    %c0_63 = arith.constant 0 : index
    %82 = vector.load %arg8[%c0_60, %c1_61, %c0_62, %c0_63] : memref<2x10x10x128xf32, #tpu.memory_space<vmem>>, vector<2x8x8x128xf32>
    %83 = vector.extract_strided_slice %3 {offsets = [3, 0], sizes = [1, 128], strides = [1, 1]} : vector<9x128xf32> to vector<1x128xf32>
    %84 = vector.shape_cast %83 : vector<1x128xf32> to vector<1x1x1x128xf32>
    %85 = vector.broadcast %84 : vector<1x1x1x128xf32> to vector<2x8x8x128xf32>
    %86 = arith.mulf %82, %85 : vector<2x8x8x128xf32>
    %87 = arith.addf %81, %86 : vector<2x8x8x128xf32>
    %c0_64 = arith.constant 0 : index
    %c1_65 = arith.constant 1 : index
    %c1_66 = arith.constant 1 : index
    %c0_67 = arith.constant 0 : index
    %88 = vector.load %arg8[%c0_64, %c1_65, %c1_66, %c0_67] : memref<2x10x10x128xf32, #tpu.memory_space<vmem>>, vector<2x8x8x128xf32>
    %89 = vector.extract_strided_slice %3 {offsets = [4, 0], sizes = [1, 128], strides = [1, 1]} : vector<9x128xf32> to vector<1x128xf32>
    %90 = vector.shape_cast %89 : vector<1x128xf32> to vector<1x1x1x128xf32>
    %91 = vector.broadcast %90 : vector<1x1x1x128xf32> to vector<2x8x8x128xf32>
    %92 = arith.mulf %88, %91 : vector<2x8x8x128xf32>
    %93 = arith.addf %87, %92 : vector<2x8x8x128xf32>
    %c0_68 = arith.constant 0 : index
    %c1_69 = arith.constant 1 : index
    %c2_70 = arith.constant 2 : index
    %c0_71 = arith.constant 0 : index
    %94 = vector.load %arg8[%c0_68, %c1_69, %c2_70, %c0_71] : memref<2x10x10x128xf32, #tpu.memory_space<vmem>>, vector<2x8x8x128xf32>
    %95 = vector.extract_strided_slice %3 {offsets = [5, 0], sizes = [1, 128], strides = [1, 1]} : vector<9x128xf32> to vector<1x128xf32>
    %96 = vector.shape_cast %95 : vector<1x128xf32> to vector<1x1x1x128xf32>
    %97 = vector.broadcast %96 : vector<1x1x1x128xf32> to vector<2x8x8x128xf32>
    %98 = arith.mulf %94, %97 : vector<2x8x8x128xf32>
    %99 = arith.addf %93, %98 : vector<2x8x8x128xf32>
    %c0_72 = arith.constant 0 : index
    %c2_73 = arith.constant 2 : index
    %c0_74 = arith.constant 0 : index
    %c0_75 = arith.constant 0 : index
    %100 = vector.load %arg8[%c0_72, %c2_73, %c0_74, %c0_75] : memref<2x10x10x128xf32, #tpu.memory_space<vmem>>, vector<2x8x8x128xf32>
    %101 = vector.extract_strided_slice %3 {offsets = [6, 0], sizes = [1, 128], strides = [1, 1]} : vector<9x128xf32> to vector<1x128xf32>
    %102 = vector.shape_cast %101 : vector<1x128xf32> to vector<1x1x1x128xf32>
    %103 = vector.broadcast %102 : vector<1x1x1x128xf32> to vector<2x8x8x128xf32>
    %104 = arith.mulf %100, %103 : vector<2x8x8x128xf32>
    %105 = arith.addf %99, %104 : vector<2x8x8x128xf32>
    %c0_76 = arith.constant 0 : index
    %c2_77 = arith.constant 2 : index
    %c1_78 = arith.constant 1 : index
    %c0_79 = arith.constant 0 : index
    %106 = vector.load %arg8[%c0_76, %c2_77, %c1_78, %c0_79] : memref<2x10x10x128xf32, #tpu.memory_space<vmem>>, vector<2x8x8x128xf32>
    %107 = vector.extract_strided_slice %3 {offsets = [7, 0], sizes = [1, 128], strides = [1, 1]} : vector<9x128xf32> to vector<1x128xf32>
    %108 = vector.shape_cast %107 : vector<1x128xf32> to vector<1x1x1x128xf32>
    %109 = vector.broadcast %108 : vector<1x1x1x128xf32> to vector<2x8x8x128xf32>
    %110 = arith.mulf %106, %109 : vector<2x8x8x128xf32>
    %111 = arith.addf %105, %110 : vector<2x8x8x128xf32>
    %c0_80 = arith.constant 0 : index
    %c2_81 = arith.constant 2 : index
    %c2_82 = arith.constant 2 : index
    %c0_83 = arith.constant 0 : index
    %112 = vector.load %arg8[%c0_80, %c2_81, %c2_82, %c0_83] : memref<2x10x10x128xf32, #tpu.memory_space<vmem>>, vector<2x8x8x128xf32>
    %113 = vector.extract_strided_slice %3 {offsets = [8, 0], sizes = [1, 128], strides = [1, 1]} : vector<9x128xf32> to vector<1x128xf32>
    %114 = vector.shape_cast %113 : vector<1x128xf32> to vector<1x1x1x128xf32>
    %115 = vector.broadcast %114 : vector<1x1x1x128xf32> to vector<2x8x8x128xf32>
    %116 = arith.mulf %112, %115 : vector<2x8x8x128xf32>
    %117 = arith.addf %111, %116 : vector<2x8x8x128xf32>
    %118 = vector.shape_cast %117 : vector<2x8x8x128xf32> to vector<2x64x128xf32>
    %cst_84 = arith.constant dense<0.000000e+00> : vector<2x128xf32>
    %119 = vector.multi_reduction <add>, %118, %cst_84 [1] : vector<2x64x128xf32> to vector<2x128xf32>
    %120 = vector.shape_cast %119 : vector<2x128xf32> to vector<2x1x128xf32>
    %cst_85 = arith.constant 6.400000e+01 : f32
    %121 = vector.broadcast %cst_85 : f32 to vector<2x1x128xf32>
    %122 = arith.divf %120, %121 : vector<2x1x128xf32>
    %123 = arith.mulf %118, %118 : vector<2x64x128xf32>
    %cst_86 = arith.constant dense<0.000000e+00> : vector<2x128xf32>
    %124 = vector.multi_reduction <add>, %123, %cst_86 [1] : vector<2x64x128xf32> to vector<2x128xf32>
    %125 = vector.shape_cast %124 : vector<2x128xf32> to vector<2x1x128xf32>
    %cst_87 = arith.constant 6.400000e+01 : f32
    %126 = vector.broadcast %cst_87 : f32 to vector<2x1x128xf32>
    %127 = arith.divf %125, %126 : vector<2x1x128xf32>
    %128 = arith.mulf %122, %122 : vector<2x1x128xf32>
    %129 = arith.subf %127, %128 : vector<2x1x128xf32>
    %cst_88 = arith.constant 0.000000e+00 : f32
    %130 = vector.broadcast %cst_88 : f32 to vector<2x1x128xf32>
    %131 = arith.maximumf %129, %130 : vector<2x1x128xf32>
    %cst_89 = arith.constant 9.99999974E-6 : f32
    %132 = vector.broadcast %cst_89 : f32 to vector<2x1x128xf32>
    %133 = arith.addf %131, %132 : vector<2x1x128xf32>
    %134 = math.rsqrt %133 : vector<2x1x128xf32>
    %135 = vector.shape_cast %4 : vector<1x128xf32> to vector<1x1x128xf32>
    %136 = vector.broadcast %135 : vector<1x1x128xf32> to vector<2x1x128xf32>
    %137 = arith.mulf %136, %134 : vector<2x1x128xf32>
    %138 = arith.mulf %122, %137 : vector<2x1x128xf32>
    %139 = vector.shape_cast %5 : vector<1x128xf32> to vector<1x1x128xf32>
    %140 = vector.broadcast %139 : vector<1x1x128xf32> to vector<2x1x128xf32>
    %141 = arith.subf %140, %138 : vector<2x1x128xf32>
    %142 = vector.broadcast %137 : vector<2x1x128xf32> to vector<2x64x128xf32>
    %143 = arith.mulf %118, %142 : vector<2x64x128xf32>
    %144 = vector.broadcast %141 : vector<2x1x128xf32> to vector<2x64x128xf32>
    %145 = arith.addf %143, %144 : vector<2x64x128xf32>
    %cst_90 = arith.constant 5.000000e-01 : f32
    %146 = vector.broadcast %cst_90 : f32 to vector<2x64x128xf32>
    %147 = arith.mulf %146, %145 : vector<2x64x128xf32>
    %cst_91 = arith.constant 0.0356774069 : f32
    %148 = vector.broadcast %cst_91 : f32 to vector<2x64x128xf32>
    %149 = arith.mulf %148, %145 : vector<2x64x128xf32>
    %150 = arith.mulf %149, %145 : vector<2x64x128xf32>
    %cst_92 = arith.constant 0.797884583 : f32
    %151 = vector.broadcast %cst_92 : f32 to vector<2x64x128xf32>
    %152 = arith.addf %151, %150 : vector<2x64x128xf32>
    %153 = arith.mulf %145, %152 : vector<2x64x128xf32>
    %154 = math.tanh %153 : vector<2x64x128xf32>
    %cst_93 = arith.constant 1.000000e+00 : f32
    %155 = vector.broadcast %cst_93 : f32 to vector<2x64x128xf32>
    %156 = arith.addf %155, %154 : vector<2x64x128xf32>
    %157 = arith.mulf %147, %156 : vector<2x64x128xf32>
    %158 = vector.shape_cast %157 : vector<2x64x128xf32> to vector<128x128xf32>
    %159 = arith.truncf %158 : vector<128x128xf32> to vector<128x128xbf16>
    %c0_94 = arith.constant 0 : index
    %c0_95 = arith.constant 0 : index
    %160 = vector.load %arg4[%c0_94, %c0_95] : memref<128x128xbf16, #tpu.memory_space<vmem>>, vector<128x128xbf16>
    %cst_96 = arith.constant dense<0.000000e+00> : vector<128x128xf32>
    %161 = tpu.matmul %159, %160, %cst_96 {dimension_numbers = #tpu.dot_dimension_numbers<[1], [0], [0], [1], [0, 0, 1, 1], [], []>} : vector<128x128xbf16>, vector<128x128xbf16>, vector<128x128xf32> -> vector<128x128xf32>
    %162 = vector.shape_cast %161 : vector<128x128xf32> to vector<2x64x128xf32>
    %cst_97 = arith.constant dense<0.000000e+00> : vector<2x128xf32>
    %163 = vector.multi_reduction <add>, %162, %cst_97 [1] : vector<2x64x128xf32> to vector<2x128xf32>
    %164 = vector.shape_cast %163 : vector<2x128xf32> to vector<2x1x128xf32>
    %cst_98 = arith.constant 6.400000e+01 : f32
    %165 = vector.broadcast %cst_98 : f32 to vector<2x1x128xf32>
    %166 = arith.divf %164, %165 : vector<2x1x128xf32>
    %167 = arith.mulf %162, %162 : vector<2x64x128xf32>
    %cst_99 = arith.constant dense<0.000000e+00> : vector<2x128xf32>
    %168 = vector.multi_reduction <add>, %167, %cst_99 [1] : vector<2x64x128xf32> to vector<2x128xf32>
    %169 = vector.shape_cast %168 : vector<2x128xf32> to vector<2x1x128xf32>
    %cst_100 = arith.constant 6.400000e+01 : f32
    %170 = vector.broadcast %cst_100 : f32 to vector<2x1x128xf32>
    %171 = arith.divf %169, %170 : vector<2x1x128xf32>
    %172 = arith.mulf %166, %166 : vector<2x1x128xf32>
    %173 = arith.subf %171, %172 : vector<2x1x128xf32>
    %cst_101 = arith.constant 0.000000e+00 : f32
    %174 = vector.broadcast %cst_101 : f32 to vector<2x1x128xf32>
    %175 = arith.maximumf %173, %174 : vector<2x1x128xf32>
    %cst_102 = arith.constant 9.99999974E-6 : f32
    %176 = vector.broadcast %cst_102 : f32 to vector<2x1x128xf32>
    %177 = arith.addf %175, %176 : vector<2x1x128xf32>
    %178 = math.rsqrt %177 : vector<2x1x128xf32>
    %179 = vector.shape_cast %6 : vector<1x128xf32> to vector<1x1x128xf32>
    %180 = vector.broadcast %179 : vector<1x1x128xf32> to vector<2x1x128xf32>
    %181 = arith.mulf %180, %178 : vector<2x1x128xf32>
    %182 = arith.mulf %166, %181 : vector<2x1x128xf32>
    %183 = vector.shape_cast %7 : vector<1x128xf32> to vector<1x1x128xf32>
    %184 = vector.broadcast %183 : vector<1x1x128xf32> to vector<2x1x128xf32>
    %185 = arith.subf %184, %182 : vector<2x1x128xf32>
    %186 = vector.broadcast %181 : vector<2x1x128xf32> to vector<2x64x128xf32>
    %187 = arith.mulf %162, %186 : vector<2x64x128xf32>
    %188 = vector.broadcast %185 : vector<2x1x128xf32> to vector<2x64x128xf32>
    %189 = arith.addf %187, %188 : vector<2x64x128xf32>
    %cst_103 = arith.constant dense<0.000000e+00> : vector<2x128xf32>
    %190 = vector.multi_reduction <add>, %189, %cst_103 [1] : vector<2x64x128xf32> to vector<2x128xf32>
    %cst_104 = arith.constant 6.400000e+01 : f32
    %191 = vector.broadcast %cst_104 : f32 to vector<2x128xf32>
    %192 = arith.divf %190, %191 : vector<2x128xf32>
    %193 = arith.truncf %192 : vector<2x128xf32> to vector<2x128xbf16>
    %c0_105 = arith.constant 0 : index
    %c0_106 = arith.constant 0 : index
    %194 = vector.load %arg5[%c0_105, %c0_106] : memref<128x128xbf16, #tpu.memory_space<vmem>>, vector<128x128xbf16>
    %cst_107 = arith.constant dense<0.000000e+00> : vector<2x128xf32>
    %195 = tpu.matmul %193, %194, %cst_107 {dimension_numbers = #tpu.dot_dimension_numbers<[1], [0], [0], [1], [0, 0, 1, 1], [], []>} : vector<2x128xbf16>, vector<128x128xbf16>, vector<2x128xf32> -> vector<2x128xf32>
    %196 = vector.broadcast %8 : vector<1x128xf32> to vector<2x128xf32>
    %197 = arith.addf %195, %196 : vector<2x128xf32>
    %cst_108 = arith.constant 5.000000e-01 : f32
    %198 = vector.broadcast %cst_108 : f32 to vector<2x128xf32>
    %199 = arith.mulf %198, %197 : vector<2x128xf32>
    %cst_109 = arith.constant 0.0356774069 : f32
    %200 = vector.broadcast %cst_109 : f32 to vector<2x128xf32>
    %201 = arith.mulf %200, %197 : vector<2x128xf32>
    %202 = arith.mulf %201, %197 : vector<2x128xf32>
    %cst_110 = arith.constant 0.797884583 : f32
    %203 = vector.broadcast %cst_110 : f32 to vector<2x128xf32>
    %204 = arith.addf %203, %202 : vector<2x128xf32>
    %205 = arith.mulf %197, %204 : vector<2x128xf32>
    %206 = math.tanh %205 : vector<2x128xf32>
    %cst_111 = arith.constant 1.000000e+00 : f32
    %207 = vector.broadcast %cst_111 : f32 to vector<2x128xf32>
    %208 = arith.addf %207, %206 : vector<2x128xf32>
    %209 = arith.mulf %199, %208 : vector<2x128xf32>
    %210 = arith.truncf %209 : vector<2x128xf32> to vector<2x128xbf16>
    %c0_112 = arith.constant 0 : index
    %c0_113 = arith.constant 0 : index
    %211 = vector.load %arg6[%c0_112, %c0_113] : memref<128x128xbf16, #tpu.memory_space<vmem>>, vector<128x128xbf16>
    %cst_114 = arith.constant dense<0.000000e+00> : vector<2x128xf32>
    %212 = tpu.matmul %210, %211, %cst_114 {dimension_numbers = #tpu.dot_dimension_numbers<[1], [0], [0], [1], [0, 0, 1, 1], [], []>} : vector<2x128xbf16>, vector<128x128xbf16>, vector<2x128xf32> -> vector<2x128xf32>
    %213 = vector.broadcast %9 : vector<1x128xf32> to vector<2x128xf32>
    %214 = arith.addf %212, %213 : vector<2x128xf32>
    %215 = arith.negf %214 : vector<2x128xf32>
    %216 = math.exp %215 : vector<2x128xf32>
    %cst_115 = arith.constant 1.000000e+00 : f32
    %217 = vector.broadcast %cst_115 : f32 to vector<2x128xf32>
    %218 = arith.addf %217, %216 : vector<2x128xf32>
    %219 = arith.divf %217, %218 : vector<2x128xf32>
    %220 = vector.shape_cast %219 : vector<2x128xf32> to vector<2x1x128xf32>
    %221 = vector.broadcast %220 : vector<2x1x128xf32> to vector<2x64x128xf32>
    %222 = arith.mulf %189, %221 : vector<2x64x128xf32>
    %223 = vector.extract_strided_slice %222 {offsets = [0, 0, 0], sizes = [1, 64, 128], strides = [1, 1, 1]} : vector<2x64x128xf32> to vector<1x64x128xf32>
    %224 = vector.shape_cast %223 : vector<1x64x128xf32> to vector<64x128xf32>
    %225 = tpu.transpose %224, [1, 0] : vector<64x128xf32> -> vector<128x64xf32>
    %226 = vector.extract_strided_slice %225 {offsets = [0, 0], sizes = [32, 64], strides = [1, 1]} : vector<128x64xf32> to vector<32x64xf32>
    %c0_116 = arith.constant 0 : index
    %c0_117 = arith.constant 0 : index
    %c0_118 = arith.constant 0 : index
    %227 = vector.load %arg7[%c0_116, %c0_117, %c0_118] : memref<2x32x64xf32, #tpu.memory_space<vmem>>, vector<1x32x64xf32>
    %228 = vector.shape_cast %227 : vector<1x32x64xf32> to vector<32x64xf32>
    %229 = vector.shape_cast %226 : vector<32x64xf32> to vector<1x32x64xf32>
    tpu.vector_store %arg7[%c0_116, %c0_117, %c0_118], %229 {strides = array<i32>} : memref<2x32x64xf32, #tpu.memory_space<vmem>>, vector<1x32x64xf32>,
    %230 = vector.extract_strided_slice %222 {offsets = [1, 0, 0], sizes = [1, 64, 128], strides = [1, 1, 1]} : vector<2x64x128xf32> to vector<1x64x128xf32>
    %231 = vector.shape_cast %230 : vector<1x64x128xf32> to vector<64x128xf32>
    %232 = tpu.transpose %231, [1, 0] : vector<64x128xf32> -> vector<128x64xf32>
    %233 = vector.extract_strided_slice %232 {offsets = [0, 0], sizes = [32, 64], strides = [1, 1]} : vector<128x64xf32> to vector<32x64xf32>
    %c1_119 = arith.constant 1 : index
    %c0_120 = arith.constant 0 : index
    %c0_121 = arith.constant 0 : index
    %234 = vector.load %arg7[%c1_119, %c0_120, %c0_121] : memref<2x32x64xf32, #tpu.memory_space<vmem>>, vector<1x32x64xf32>
    %235 = vector.shape_cast %234 : vector<1x32x64xf32> to vector<32x64xf32>
    %236 = vector.shape_cast %233 : vector<32x64xf32> to vector<1x32x64xf32>
    tpu.vector_store %arg7[%c1_119, %c0_120, %c0_121], %236 {strides = array<i32>} : memref<2x32x64xf32, #tpu.memory_space<vmem>>, vector<1x32x64xf32>,
    return
  }
  func.func @transform_0(%arg0: i32) -> (i32, i32, i32) {
    %c0_i32 = arith.constant 0 : i32
    %c0_i32_0 = arith.constant 0 : i32
    %c0_i32_1 = arith.constant 0 : i32
    return %arg0, %c0_i32, %c0_i32_0 : i32, i32, i32
  }
  func.func @transform_1(%arg0: i32) -> (i32, i32) {
    %c0_i32 = arith.constant 0 : i32
    %c0_i32_0 = arith.constant 0 : i32
    %c0_i32_1 = arith.constant 0 : i32
    return %c0_i32, %c0_i32_0 : i32, i32
  }
  func.func @transform_2(%arg0: i32) -> (i32, i32) {
    %c0_i32 = arith.constant 0 : i32
    %c0_i32_0 = arith.constant 0 : i32
    %c0_i32_1 = arith.constant 0 : i32
    return %c0_i32, %c0_i32_0 : i32, i32
  }
  func.func @transform_3(%arg0: i32) -> (i32, i32) {
    %c0_i32 = arith.constant 0 : i32
    %c0_i32_0 = arith.constant 0 : i32
    %c0_i32_1 = arith.constant 0 : i32
    return %c0_i32, %c0_i32_0 : i32, i32
  }
  func.func @transform_4(%arg0: i32) -> (i32, i32) {
    %c0_i32 = arith.constant 0 : i32
    %c0_i32_0 = arith.constant 0 : i32
    %c0_i32_1 = arith.constant 0 : i32
    return %c0_i32, %c0_i32_0 : i32, i32
  }
  func.func @transform_5(%arg0: i32) -> (i32, i32) {
    %c0_i32 = arith.constant 0 : i32
    %c0_i32_0 = arith.constant 0 : i32
    %c0_i32_1 = arith.constant 0 : i32
    return %c0_i32, %c0_i32_0 : i32, i32
  }
  func.func @transform_6(%arg0: i32) -> (i32, i32, i32) {
    %c0_i32 = arith.constant 0 : i32
    %c0_i32_0 = arith.constant 0 : i32
    %c0_i32_1 = arith.constant 0 : i32
    return %arg0, %c0_i32, %c0_i32_0 : i32, i32, i32
  }
}

</mosaic_0001>

<bundles_post_ra>
// kernel: tpu_custom_call.1
= control target key start
LH: loop header
LB: loop body
LE: loop exit
PB: predicated region body
PF: predicated region fallthrough
CT: control target
= control target key end

     0   :  { %11 = vsyncpa [#allocation4], 0  ;;  %s3659_s0 = inlined_call_operand.vmem [shape: f32[2,64,8], index: 0, kind: input, shape index: {}]   ;;  %s3660_s1 = inlined_call_operand.hbm [shape: f32[17,128], index: 1, kind: input, shape index: {}]   ;;  %s3661_s2 = inlined_call_operand.vmem [shape: bf16[8,128], index: 2, kind: input, shape index: {}]   ;;  %s3662_s3 = inlined_call_operand.vmem [shape: bf16[128,128], index: 3, kind: input, shape index: {}]   ;;  %s3663_s4 = inlined_call_operand.vmem [shape: bf16[128,128], index: 4, kind: input, shape index: {}]   ;;  %s3664_s5 = inlined_call_operand.hbm [shape: bf16[128,128], index: 5, kind: input, shape index: {}]   ;;  %s3665_s6 = inlined_call_operand.hbm [shape: f32[2,32,64], index: 6, kind: output, shape index: {}]  }
   0x1   :  { %12 = vsyncpa [#allocation7], 0 }
   0x2   :  { %13 = vsyncpa [#allocation5], 0  ;;  %s2386_s21 = smov [#allocation3]   ;;  %s2314_s25 = scalar_lea.hbm %s3660_s1, 384 }
   0x3   :  { %s21_s22 = sshll.u32 %s2386_s21, 4  ;;  %p2315_p0 = scmp.ne.s32.totalorder %s3660_s1, %s2314_s25  ;;  %s22_s22 = int_to_ptr.vmem [resolvable:$true] %s21_s22 }
   0x4   :  { %p2318_p1 = scmp.lt.u32.totalorder %s2314_s25, %s3660_s1 }
   0x6   :  { %p2320_p2 = pnand %p2318_p1, %p2315_p0 }
   0x8   :  { %2323 = shalt.err (!%p2320_p2)
}
   0x9   :  { %s2324_s30 = scalar_lea.vmem %s22_s22, 384  ;;  %p2329_p4 = scmp.lt.s32.totalorder %s22_s22, %s22_s22 }
   0xa   :  { %p2325_p3 = scmp.ne.s32.totalorder %s22_s22, %s2324_s30  ;;  %p2330_p5 = scmp.lt.s32.totalorder %s2324_s30, %s2324_s30 }
   0xc   :  { %p2331_p6 = por %p2330_p5, %p2329_p4 }
   0xe   :  { %p2332_p7 = pnand %p2331_p6, %p2325_p3 }
  0x10   :  { %2335 = shalt.err (!%p2332_p7)
}
  0x11   :  { %s2387_s7 = smov 128   ;;  %s2388_s8 = smov 8  }
  0x12   :  { %27 = dma.hbm_to_vmem [thread:$0]  %s3660_s1, 384, %s22_s22, [#allocation4], %s2387_s7, %s2387_s7, %s2388_s8  }
  0x13   :  { %s2389_s11 = smov [#allocation6]   ;;  %s2336_s15 = scalar_lea.hbm %s3664_s5, 1024 }
  0x14   :  { %s39_s12 = sshll.u32 %s2389_s11, 4  ;;  %p2337_p8 = scmp.ne.s32.totalorder %s3664_s5, %s2336_s15  ;;  %s40_s12 = int_to_ptr.vmem [resolvable:$true] %s39_s12 }
  0x15   :  { %p2340_p9 = scmp.lt.u32.totalorder %s2336_s15, %s3664_s5 }
  0x17   :  { %p2342_p10 = pnand %p2340_p9, %p2337_p8 }
  0x19   :  { %2345 = shalt.err (!%p2342_p10)
}
  0x1a   :  { %s2346_s20 = scalar_lea.vmem %s40_s12, 1024  ;;  %p2351_p12 = scmp.lt.s32.totalorder %s40_s12, %s40_s12 }
  0x1b   :  { %p2347_p11 = scmp.ne.s32.totalorder %s40_s12, %s2346_s20  ;;  %p2352_p13 = scmp.lt.s32.totalorder %s2346_s20, %s2346_s20 }
  0x1d   :  { %p2353_p0 = por %p2352_p13, %p2351_p12 }
  0x1f   :  { %p2354_p1 = pnand %p2353_p0, %p2347_p11 }
  0x21   :  { %2357 = shalt.err (!%p2354_p1)
}
  0x22   :  { %s2390_s1 = smov 64   ;;  %s2391_s21 = smov 4  }
  0x23   :  { %45 = dma.hbm_to_vmem [thread:$0]  %s3664_s5, 1024, %s40_s12, [#allocation7], %s2390_s1, %s2390_s1, %s2391_s21  }
  0x24   :  { %2380 = dma.done.wait [#allocation4], 384  }
  0x25   :  { %2381 = vsyncadd [#allocation4], 4294966912 }
  0x26   :  { %2382 = dma.done.wait [#allocation7], 1024  }
  0x27   :  { %2383 = vsyncadd [#allocation7], 4294966272  ;;  %vm106_vm0 = vcmask 1043456   ;;  %v80_v0 = vld [vmem:[%s3661_s2] sm:$0xf]  ;;  %v57_v2 = vld [vmem:[%s3659_s0 + $0x8] sm:$0xff] }
  0x28   :  { %v56_v1 = vld [vmem:[%s3659_s0] sm:$0xff]  ;;  %vm81_vm1 = vcmask 64512   ;;  %2196 = vmatprep.subr.msk.bf16.mxu0 %vm106_vm0, %v80_v0  ;;  %v108_v3 = vsel %vm106_vm0, %v80_v0, 0  ;;  %v58_v5 = vld [vmem:[%s3659_s0 + $0x10] sm:$0xff]  ;;  %v59_v6 = vld [vmem:[%s3659_s0 + $0x18] sm:$0xff]  ;;  %vm2393_vm2 = vmmov 0  }
  0x29   :  { %v72_v4 = vpack.c.bf16 %v57_v2, %v56_v1  ;;  %v60_v7 = vld [vmem:[%s3659_s0 + $0x20] sm:$0xff]  ;;  %2107 = vmatpush3.bf16.msra.mxu0 %v108_v3  ;;  %v73_v8 = vpack.c.bf16 %v59_v6, %v58_v5  ;;  %v61_v9 = vld [vmem:[%s3659_s0 + $0x28] sm:$0xff]  ;;  %v62_v11 = vld [vmem:[%s3659_s0 + $0x30] sm:$0xff]  ;;  %vm1673_vm3 = vcmask 1041409   ;;  %vm1969_vm4 = vcmask 523264  }
  0x2a   :  { %v74_v10 = vpack.c.bf16 %v61_v9, %v60_v7  ;;  %v63_v12 = vld [vmem:[%s3659_s0 + $0x38] sm:$0xff]  ;;  %v64_v13 = vld [vmem:[%s3659_s0 + $0x40] sm:$0xff]  ;;  %v65_v14 = vld [vmem:[%s3659_s0 + $0x48] sm:$0xff] }
  0x2b   :  { %2108 = vmatprep.mubr.msk.bf16.mxu0 %vm81_vm1, %v72_v4  ;;  %v75_v15 = vpack.c.bf16 %v63_v12, %v62_v11  ;;  %v76_v16 = vpack.c.bf16 %v65_v14, %v64_v13  ;;  %v66_v17 = vld [vmem:[%s3659_s0 + $0x50] sm:$0xff]  ;;  %v67_v18 = vld [vmem:[%s3659_s0 + $0x58] sm:$0xff]  ;;  %v68_v19 = vld [vmem:[%s3659_s0 + $0x60] sm:$0xff] }
  0x2c   :  { %2109 = vmatmul.mubr.msk.bf16.vlgmr.msra.gmra.mrb[0].mxu0 %vm81_vm1, %v73_v8  ;;  %v69_v20 = vld [vmem:[%s3659_s0 + $0x68] sm:$0xff]  ;;  %v77_v21 = vpack.c.bf16 %v67_v18, %v66_v17  ;;  %v70_v23 = vld [vmem:[%s3659_s0 + $0x70] sm:$0xff]  ;;  %v71_v24 = vld [vmem:[%s3659_s0 + $0x78] sm:$0xff] }
  0x2d   :  { %2112 = vmatprep.mubr.msk.bf16.mxu0 %vm81_vm1, %v74_v10  ;;  %v78_v22 = vpack.c.bf16 %v69_v20, %v68_v19  ;;  %v79_v25 = vpack.c.bf16 %v71_v24, %v70_v23  ;;  %v2207_v36 = vld [vmem:[%s3662_s3] sm:$0xff]   ;;  %v2208_v37 = vld [vmem:[%s3662_s3 + $0x8] sm:$0xff]   ;;  %v2209_v47 = vld [vmem:[%s3662_s3 + $0x10] sm:$0xff]  }
  0x2e   :  { %2124 = vmatprep.subr.bf16.mxu1 %v2207_v36  ;;  %v2210_v55 = vld [vmem:[%s3662_s3 + $0x18] sm:$0xff]   ;;  %v2211_v0 = vld [vmem:[%s3662_s3 + $0x20] sm:$0xff]   ;;  %v2212_v12 = vld [vmem:[%s3662_s3 + $0x28] sm:$0xff]  }
  0x2f   :  { %2125 = vmatpush3.bf16.msra.mxu1 %v2207_v36 }
  0x30   :  { %2126 = vmatprep.subr.bf16.mxu1 %v2208_v37 }
  0x33   :  { %2127 = vmatpush3.bf16.msra.mxu1 %v2208_v37 }
  0x34   :  { %2113 = vmatmul.mubr.msk.bf16.gmra.mrb[4].mxu0 %vm81_vm1, %v75_v15  ;;  %2128 = vmatprep.subr.bf16.mxu1 %v2209_v47 }
  0x35   :  { %2116 = vmatprep.mubr.msk.bf16.mxu0 %vm81_vm1, %v76_v16 }
  0x37   :  { %2129 = vmatpush3.bf16.msra.mxu1 %v2209_v47 }
  0x38   :  { %2130 = vmatprep.subr.bf16.mxu1 %v2210_v55 }
  0x3b   :  { %2131 = vmatpush3.bf16.msra.mxu1 %v2210_v55 }
  0x3c   :  { %2117 = vmatmul.mubr.msk.bf16.gmra.mrb[8].mxu0 %vm81_vm1, %v77_v21  ;;  %2132 = vmatprep.subr.bf16.mxu1 %v2211_v0 }
  0x3d   :  { %2120 = vmatprep.mubr.msk.bf16.mxu0 %vm81_vm1, %v78_v22 }
  0x3f   :  { %2133 = vmatpush3.bf16.msra.mxu1 %v2211_v0 }
  0x40   :  { %2134 = vmatprep.subr.bf16.mxu1 %v2212_v12 }
  0x43   :  { %2135 = vmatpush3.bf16.msra.mxu1 %v2212_v12 }
  0x44   :  { %2121 = vmatmul.mubr.msk.bf16.gmra.mrb[12].mxu0 %vm81_vm1, %v79_v25  ;;  %v2213_v25 = vld [vmem:[%s3662_s3 + $0x30] sm:$0xff]  }
  0x45   :  { %2136 = vmatprep.subr.bf16.mxu1 %v2213_v25 }
  0x47   :  { %2137 = vmatpush3.bf16.msra.mxu1 %v2213_v25 }
  0xff   :  { %v2517_v26 = vpop.f32.mrb[0].mxu0 }
 0x100   :  { %v2519_v27 = vpop.f32.mrb[1].mxu0  ;;  %v238_v33 = vmul.f32 %v2517_v26, %v2517_v26 }
 0x101   :  { %v2521_v28 = vpop.f32.mrb[2].mxu0  ;;  %v236_v30 = vmul.f32 %v2519_v27, %v2519_v27 }
 0x102   :  { %v2523_v29 = vpop.f32.mrb[3].mxu0  ;;  %v239_v38 = vmul.f32 %v2521_v28, %v2521_v28 }
 0x103   :  { %v207_v31 = vadd.f32 %v2523_v29, %v2519_v27  ;;  %v237_v32 = vmul.f32 %v2523_v29, %v2523_v29 }
 0x105   :  { %v208_v34 = vadd.f32 %v2517_v26, %v207_v31  ;;  %v252_v35 = vadd.f32 %v237_v32, %v236_v30 }
 0x107   :  { %v253_v39 = vadd.f32 %v252_v35, %v238_v33  ;;  %v2542_v40 = vpop.f32.mrb[4].mxu0  ;;  %v209_v41 = vadd.f32 %v2521_v28, %v208_v34 }
 0x108   :  { %v2545_v42 = vpop.f32.mrb[5].mxu0  ;;  %v242_v52 = vmul.f32 %v2542_v40, %v2542_v40 }
 0x109   :  { %v210_v43 = vadd.f32 %v209_v41, %v2545_v42  ;;  %v240_v44 = vmul.f32 %v2545_v42, %v2545_v42  ;;  %v254_v45 = vadd.f32 %v253_v39, %v239_v38  ;;  %v2550_v46 = vpop.f32.mrb[6].mxu0  ;;  %v2214_v41 = vld [vmem:[%s3662_s3 + $0x38] sm:$0xff]  }
 0x10a   :  { %v2555_v48 = vpop.f32.mrb[7].mxu0  ;;  %v243_v56 = vmul.f32 %v2550_v46, %v2550_v46  ;;  %2138 = vmatprep.subr.bf16.mxu1 %v2214_v41 }
 0x10b   :  { %v255_v49 = vadd.f32 %v254_v45, %v240_v44  ;;  %v211_v50 = vadd.f32 %v210_v43, %v2555_v48  ;;  %v241_v51 = vmul.f32 %v2555_v48, %v2555_v48  ;;  %2139 = vmatpush3.bf16.msra.mxu1 %v2214_v41 }
 0x10d   :  { %v212_v53 = vadd.f32 %v2542_v40, %v211_v50  ;;  %v256_v54 = vadd.f32 %v255_v49, %v241_v51 }
 0x10f   :  { %v213_v57 = vadd.f32 %v2550_v46, %v212_v53  ;;  %v257_v58 = vadd.f32 %v256_v54, %v242_v52  ;;  %v2569_v59 = vpop.f32.mrb[8].mxu0 }
 0x110   :  { %v2571_v60 = vpop.f32.mrb[9].mxu0  ;;  %v246_v7 = vmul.f32 %v2569_v59, %v2569_v59 }
 0x111   :  { %v214_v61 = vrot.slane %v213_v57, 4  ;;  %v258_v62 = vadd.f32 %v257_v58, %v243_v56  ;;  %v2573_v63 = vpop.f32.mrb[10].mxu0  ;;  %v244_v1 = vmul.f32 %v2571_v60, %v2571_v60 }
 0x112   :  { %v2580_v2 = vpop.f32.mrb[11].mxu0  ;;  %v247_v18 = vmul.f32 %v2573_v63, %v2573_v63 }
 0x113   :  { %v215_v3 = vadd.f32 %v214_v61, %v213_v57  ;;  %v259_v4 = vrot.slane %v258_v62, 4  ;;  %v220_v5 = vadd.f32 %v2580_v2, %v2571_v60  ;;  %v245_v6 = vmul.f32 %v2580_v2, %v2580_v2 }
 0x115   :  { %v216_v8 = vrot.slane %v215_v3, 2  ;;  %v260_v9 = vadd.f32 %v259_v4, %v258_v62  ;;  %v221_v10 = vadd.f32 %v2569_v59, %v220_v5  ;;  %v265_v11 = vadd.f32 %v245_v6, %v244_v1 }
 0x116   :  { %v302_v1 = vlaneseq }
 0x117   :  { %v217_v13 = vadd.f32 %v216_v8, %v215_v3  ;;  %v261_v14 = vrot.slane %v260_v9, 2  ;;  %v266_v15 = vadd.f32 %v265_v11, %v246_v7  ;;  %v2592_v16 = vpop.f32.mrb[12].mxu0  ;;  %v222_v17 = vadd.f32 %v2573_v63, %v221_v10  ;;  %v2625_v11 = vld [vmem:[#allocation3] sm:$0xff] }
 0x118   :  { %v2597_v19 = vpop.f32.mrb[13].mxu0  ;;  %v250_v43 = vmul.f32 %v2592_v16, %v2592_v16  ;;  %v2621_v7 = vshrl.u32 %v302_v1, 7 }
 0x119   :  { %v218_v20 = vrot.slane %v217_v13, 1  ;;  %v262_v21 = vadd.f32 %v261_v14, %v260_v9  ;;  %v223_v22 = vadd.f32 %v222_v17, %v2597_v19  ;;  %v248_v23 = vmul.f32 %v2597_v19, %v2597_v19  ;;  %v2602_v24 = vpop.f32.mrb[14].mxu0 }
 0x11a   :  { %v267_v30 = vadd.f32 %v266_v15, %v247_v18  ;;  %v2607_v31 = vpop.f32.mrb[15].mxu0  ;;  %v251_v50 = vmul.f32 %v2602_v24, %v2602_v24  ;;  %3695 = vst [vmem:[#allocation12_spill] sm:$0xff] %v2621_v7 }
 0x11b   :  { %v219_v32 = vadd.f32 %v218_v20, %v217_v13  ;;  %v263_v33 = vrot.slane %v262_v21, 1  ;;  %v224_v34 = vadd.f32 %v223_v22, %v2607_v31  ;;  %v249_v35 = vmul.f32 %v2607_v31, %v2607_v31 }
 0x11c   :  { %v268_v36 = vadd.f32 %v267_v30, %v248_v23  ;;  %v2630_v13 = vsub.s32 0, %v2621_v7  ;;  %v2635_v23 = vsub.s32 1, %v2621_v7 }
 0x11d   :  { %v234_v37 = vmul.f32 0.015625, %v219_v32  ;;  %v264_v38 = vadd.f32 %v263_v33, %v262_v21  ;;  %v225_v39 = vadd.f32 %v2592_v16, %v224_v34 }
 0x11e   :  { %v269_v44 = vadd.f32 %v268_v36, %v249_v35  ;;  %3696 = vst [vmem:[#allocation13_spill] sm:$0xff] %v2630_v13 }
 0x11f   :  { %v278_v45 = vmul.f32 0.015625, %v264_v38  ;;  %v280_v47 = vmul.f32 %v234_v37, %v234_v37  ;;  %v226_v49 = vadd.f32 %v2602_v24, %v225_v39 }
 0x120   :  { %v270_v51 = vadd.f32 %v269_v44, %v250_v43 }
 0x121   :  { %v282_v52 = vsub.f32 %v278_v45, %v280_v47  ;;  %v227_v53 = vrot.slane %v226_v49, 4  ;;  %v54_v47 = vld [vmem:[#allocation3 + $0x8] sm:$0xff] }
 0x122   :  { %v271_v54 = vadd.f32 %v270_v51, %v251_v50  ;;  %v604_v51 = vsub.s32 2, %v2621_v7 }
 0x123   :  { %v284_v55 = vmax.f32 %v282_v52, 0.0  ;;  %v228_v56 = vadd.f32 %v227_v53, %v226_v49  ;;  %v2677_v53 = vsub.s32 5, %v2621_v7 }
 0x124   :  { %v272_v57 = vrot.slane %v271_v54, 4 }
 0x125   :  { %v286_v58 = vadd.f32 1e-05, %v284_v55  ;;  %v229_v61 = vrot.slane %v228_v56, 2  ;;  %3699 = vst [vmem:[#allocation16_spill] sm:$0xff] %v2677_v53 }
 0x126   :  { %v273_v62 = vadd.f32 %v272_v57, %v271_v54 }
 0x127   :  { %2231 = vrsqrt.f32 %v286_v58  ;;  %v230_v0 = vadd.f32 %v229_v61, %v228_v56 }
 0x128   :  { %v274_v3 = vrot.slane %v273_v62, 2 }
 0x129   :  { %v231_v4 = vrot.slane %v230_v0, 1 }
 0x12a   :  { %v275_v5 = vadd.f32 %v274_v3, %v273_v62 }
 0x12b   :  { %v232_v6 = vadd.f32 %v231_v4, %v230_v0  ;;  %v2690_v0 = vrot.slane %v54_v47, %v2635_v23 }
 0x12c   :  { %v276_v8 = vrot.slane %v275_v5, 1 }
 0x12d   :  { %v2623_v9 = vmul.f32 0.015625, %v232_v6 }
 0x12e   :  { %v277_v10 = vadd.f32 %v276_v8, %v275_v5 }
 0x12f   :  { %v281_v12 = vmul.f32 %v2623_v9, %v2623_v9 }
 0x130   :  { %v279_v14 = vmul.f32 0.015625, %v277_v10 }
 0x131   :  { %v2232_v15 = vpop.eup %2231 }
 0x132   :  { %v290_v17 = vmul.f32 %v2232_v15, %v2625_v11  ;;  %v283_v18 = vsub.f32 %v279_v14, %v281_v12  ;;  %v3666_v12 = vsub.s32 7, %v2621_v7 }
 0x134   :  { %v292_v20 = vmul.f32 %v290_v17, %v234_v37  ;;  %v305_v21 = vrot.slane %v290_v17, %v2630_v13  ;;  %v285_v22 = vmax.f32 %v283_v18, 0.0  ;;  %v2701_v18 = vrot.slane %v2625_v11, %v604_v51 }
 0x136   :  { %v296_v25 = vrot.slane %v292_v20, 7  ;;  %v310_v30 = vmul.f32 %v305_v21, %v2519_v27  ;;  %v311_v32 = vmul.f32 %v305_v21, %v2523_v29  ;;  %v312_v33 = vmul.f32 %v2517_v26, %v305_v21 }
 0x137   :  { %v313_v34 = vmul.f32 %v2521_v28, %v305_v21  ;;  %v314_v35 = vmul.f32 %v305_v21, %v2545_v42  ;;  %v315_v36 = vmul.f32 %v305_v21, %v2555_v48  ;;  %v316_v37 = vmul.f32 %v2542_v40, %v305_v21 }
 0x138   :  { %v300_v38 = vsub.f32 %v2625_v11, %v296_v25  ;;  %v317_v39 = vmul.f32 %v2550_v46, %v305_v21  ;;  %v287_v41 = vadd.f32 1e-05, %v285_v22  ;;  %v2648_v27 = vsub.s32 3, %v2621_v7 }
 0x139   :  { %v2651_v26 = vsub.s32 6, %v2621_v7  ;;  %v2705_v20 = vrot.slane %v2625_v11, %v2677_v53 }
 0x13a   :  { %v329_v43 = vrot.slane %v300_v38, %v2635_v23  ;;  %2233 = vrsqrt.f32 %v287_v41  ;;  %3697 = vst [vmem:[#allocation14_spill] sm:$0xff] %v2648_v27  ;;  %v2674_v52 = vrot.slane %v2625_v11, %v2648_v27  ;;  %v2715_v38 = vrot.slane %v2625_v11, %v3666_v12 }
 0x13b   :  { %3698 = vst [vmem:[#allocation15_spill] sm:$0xff] %v2651_v26  ;;  %v2684_v57 = vrot.slane %v2625_v11, %v2651_v26 }
 0x13c   :  { %v2653_v28 = vadd.f32 %v329_v43, %v310_v30  ;;  %v2655_v29 = vadd.f32 %v329_v43, %v311_v32  ;;  %v2657_v42 = vadd.f32 %v329_v43, %v312_v33  ;;  %v2659_v40 = vadd.f32 %v329_v43, %v313_v34 }
 0x13d   :  { %v2661_v48 = vadd.f32 %v329_v43, %v314_v35  ;;  %v2663_v46 = vadd.f32 %v329_v43, %v315_v36  ;;  %v2665_v44 = vadd.f32 %v329_v43, %v316_v37  ;;  %v2667_v45 = vadd.f32 %v329_v43, %v317_v39  ;;  %3700 = vst [vmem:[#allocation17_spill] sm:$0xff] %v2684_v57 }
 0x13e   :  { %v366_v49 = vmul.f32 0.035677407, %v2653_v28  ;;  %v367_v50 = vmul.f32 0.035677407, %v2655_v29  ;;  %v368_v54 = vmul.f32 0.035677407, %v2657_v42  ;;  %v2720_v43 = vrot.slane %v54_v47, %v2630_v13 }
 0x13f   :  { %v369_v55 = vmul.f32 0.035677407, %v2659_v40  ;;  %v370_v56 = vmul.f32 0.035677407, %v2661_v48  ;;  %v371_v58 = vmul.f32 0.035677407, %v2663_v46 }
 0x140   :  { %v372_v61 = vmul.f32 0.035677407, %v2665_v44  ;;  %v373_v62 = vmul.f32 0.035677407, %v2667_v45  ;;  %v382_v1 = vmul.f32 %v366_v49, %v2653_v28  ;;  %v383_v3 = vmul.f32 %v367_v50, %v2655_v29 }
 0x141   :  { %v385_v4 = vmul.f32 %v369_v55, %v2659_v40  ;;  %v386_v5 = vmul.f32 %v370_v56, %v2661_v48  ;;  %v387_v6 = vmul.f32 %v371_v58, %v2663_v46  ;;  %v384_v21 = vmul.f32 %v368_v54, %v2657_v42 }
 0x142   :  { %v388_v8 = vmul.f32 %v372_v61, %v2665_v44  ;;  %v389_v10 = vmul.f32 %v373_v62, %v2667_v45  ;;  %v398_v32 = vadd.f32 0.7978846, %v382_v1  ;;  %v399_v33 = vadd.f32 0.7978846, %v383_v3 }
 0x143   :  { %v401_v15 = vadd.f32 0.7978846, %v385_v4  ;;  %v402_v17 = vadd.f32 0.7978846, %v386_v5  ;;  %v403_v22 = vadd.f32 0.7978846, %v387_v6  ;;  %v2722_v49 = vrot.slane %v54_v47, %v604_v51 }
 0x144   :  { %v2234_v14 = vpop.eup %2233  ;;  %v404_v25 = vadd.f32 0.7978846, %v388_v8  ;;  %v405_v30 = vadd.f32 0.7978846, %v389_v10  ;;  %v2727_v55 = vsub.s32 4, %v2621_v7  ;;  %v414_v58 = vmul.f32 %v398_v32, %v2653_v28 }
 0x145   :  { %v417_v34 = vmul.f32 %v401_v15, %v2659_v40  ;;  %v418_v35 = vmul.f32 %v402_v17, %v2661_v48  ;;  %v419_v36 = vmul.f32 %v403_v22, %v2663_v46  ;;  %v291_v39 = vmul.f32 %v2234_v14, %v2625_v11  ;;  %3701 = vst [vmem:[#allocation18_spill] sm:$0xff] %v2722_v49 }
 0x146   :  { %v420_v37 = vmul.f32 %v404_v25, %v2665_v44  ;;  %v421_v41 = vmul.f32 %v405_v30, %v2667_v45  ;;  %3702 = vst [vmem:[#allocation19_spill] sm:$0xff] %v2727_v55  ;;  %v400_v56 = vadd.f32 0.7978846, %v384_v21  ;;  %v415_v61 = vmul.f32 %v399_v33, %v2655_v29 }
 0x147   :  { %2235 = vtanh.f32 %v417_v34  ;;  %v293_v50 = vmul.f32 %v291_v39, %v2623_v9  ;;  %v309_v54 = vrot.slane %v291_v39, %v2630_v13  ;;  %v2741_v10 = vmul.f32 0.5, %v2653_v28 }
 0x148   :  { %2237 = vtanh.f32 %v418_v35  ;;  %v2755_v28 = vmul.f32 0.5, %v2655_v29  ;;  %v2777_v22 = vmul.f32 0.5, %v2657_v42 }
 0x149   :  { %2239 = vtanh.f32 %v419_v36  ;;  %v297_v62 = vrot.slane %v293_v50, 7  ;;  %v318_v1 = vmul.f32 %v309_v54, %v2571_v60  ;;  %v319_v47 = vmul.f32 %v309_v54, %v2580_v2 }
 0x14a   :  { %2241 = vtanh.f32 %v420_v37  ;;  %v320_v9 = vmul.f32 %v2569_v59, %v309_v54  ;;  %v321_v51 = vmul.f32 %v2573_v63, %v309_v54  ;;  %v322_v3 = vmul.f32 %v309_v54, %v2597_v19 }
 0x14b   :  { %2243 = vtanh.f32 %v421_v41  ;;  %v301_v4 = vsub.f32 %v2625_v11, %v297_v62  ;;  %v323_v5 = vmul.f32 %v309_v54, %v2607_v31  ;;  %v324_v6 = vmul.f32 %v2592_v16, %v309_v54 }
 0x14c   :  { %v325_v8 = vmul.f32 %v2602_v24, %v309_v54  ;;  %v353_v60 = vmul.f32 0.5, %v2659_v40  ;;  %v354_v2 = vmul.f32 0.5, %v2661_v48  ;;  %v2747_v59 = vrot.slane %v2625_v11, %v2727_v55 }
 0x14d   :  { %v355_v63 = vmul.f32 0.5, %v2663_v46  ;;  %v416_v19 = vmul.f32 %v400_v56, %v2657_v42  ;;  %2245 = vtanh.f32 %v414_v58  ;;  %v333_v16 = vrot.slane %v301_v4, %v2635_v23 }
 0x14e   :  { %v356_v24 = vmul.f32 0.5, %v2665_v44  ;;  %v357_v31 = vmul.f32 0.5, %v2667_v45  ;;  %2247 = vtanh.f32 %v415_v61 }
 0x14f   :  { %v2757_v40 = vadd.f32 %v333_v16, %v318_v1  ;;  %v2759_v48 = vadd.f32 %v333_v16, %v319_v47  ;;  %v2761_v11 = vadd.f32 %v333_v16, %v320_v9  ;;  %v2763_v46 = vadd.f32 %v333_v16, %v321_v51 }
 0x150   :  { %v2765_v15 = vadd.f32 %v333_v16, %v322_v3  ;;  %v2767_v23 = vadd.f32 %v333_v16, %v323_v5  ;;  %v2769_v44 = vadd.f32 %v333_v16, %v324_v6  ;;  %v2771_v45 = vadd.f32 %v333_v16, %v325_v8 }
 0x151   :  { %3703 = vst [vmem:[#allocation20_spill] sm:$0xff] %v2761_v11  ;;  %v2236_v14 = vpop.eup %2235  ;;  %v2774_v21 = vmul.f32 0.5, %v2757_v40  ;;  %2249 = vtanh.f32 %v416_v19  ;;  %v2780_v32 = vmul.f32 0.5, %v2759_v48  ;;  %v2783_v33 = vmul.f32 0.5, %v2763_v46 }
 0x152   :  { %v2238_v29 = vpop.eup %2237  ;;  %v449_v17 = vadd.f32 1.0, %v2236_v14  ;;  %v2786_v34 = vmul.f32 0.5, %v2765_v15  ;;  %v2791_v39 = vmul.f32 0.5, %v2767_v23  ;;  %v2794_v42 = vmul.f32 0.5, %v2769_v44 }
 0x153   :  { %v2240_v25 = vpop.eup %2239  ;;  %v450_v30 = vadd.f32 1.0, %v2238_v29  ;;  %3704 = vst [vmem:[#allocation21_spill] sm:$0xff] %v2780_v32  ;;  %v374_v56 = vmul.f32 0.035677407, %v2757_v40  ;;  %v375_v58 = vmul.f32 0.035677407, %v2759_v48 }
 0x154   :  { %v2242_v35 = vpop.eup %2241  ;;  %v451_v36 = vadd.f32 1.0, %v2240_v25  ;;  %v2788_v37 = vmul.f32 %v449_v17, %v353_v60  ;;  %v376_v1 = vmul.f32 0.035677407, %v2761_v11  ;;  %v377_v47 = vmul.f32 0.035677407, %v2763_v46 }
 0x155   :  { %v2244_v41 = vpop.eup %2243  ;;  %v452_v50 = vadd.f32 1.0, %v2242_v35  ;;  %v2796_v54 = vmul.f32 %v450_v30, %v354_v2  ;;  %v378_v51 = vmul.f32 0.035677407, %v2765_v15  ;;  %v379_v3 = vmul.f32 0.035677407, %v2767_v23 }
 0x156   :  { %v453_v61 = vadd.f32 1.0, %v2244_v41  ;;  %v2800_v62 = vmul.f32 %v451_v36, %v355_v63  ;;  %482 = vst [vmem:[#allocation2 + $0x41] sm:$0xff] %v2788_v37  ;;  %v380_v4 = vmul.f32 0.035677407, %v2769_v44  ;;  %v2815_v8 = vmul.f32 0.5, %v2771_v45 }
 0x157   :  { %3705 = vst [vmem:[#allocation22_spill] sm:$0xff] %v2796_v54  ;;  %v2805_v9 = vmul.f32 %v452_v50, %v356_v24  ;;  %483 = vst [vmem:[#allocation2 + $0x51] sm:$0xff] %v2796_v54  ;;  %v2246_v5 = vpop.eup %2245  ;;  %v381_v60 = vmul.f32 0.035677407, %v2771_v45  ;;  %v390_v2 = vmul.f32 %v374_v56, %v2757_v40  ;;  %v391_v19 = vmul.f32 %v375_v58, %v2759_v48 }
 0x158   :  { %v2811_v6 = vmul.f32 %v453_v61, %v357_v31  ;;  %484 = vst [vmem:[#allocation2 + $0x61] sm:$0xff] %v2800_v62  ;;  %v2248_v63 = vpop.eup %2247  ;;  %v392_v16 = vmul.f32 %v376_v1, %v2761_v11  ;;  %v393_v24 = vmul.f32 %v377_v47, %v2763_v46  ;;  %v394_v31 = vmul.f32 %v378_v51, %v2765_v15 }
 0x159   :  { %3706 = vst [vmem:[#allocation23_spill] sm:$0xff] %v2805_v9  ;;  %485 = vst [vmem:[#allocation2 + $0x71] sm:$0xff] %v2805_v9  ;;  %v395_v14 = vmul.f32 %v379_v3, %v2767_v23  ;;  %v396_v29 = vmul.f32 %v380_v4, %v2769_v44  ;;  %v397_v17 = vmul.f32 %v381_v60, %v2771_v45  ;;  %v406_v25 = vadd.f32 0.7978846, %v390_v2 }
 0x15a   :  { %3707 = vst [vmem:[#allocation24_spill] sm:$0xff] %v2811_v6  ;;  %504 = vst [vmem:[#allocation2 + $0x91] sm:$0xff] %v2805_v9  ;;  %v2831_v30 = vmul.f32 %v2674_v52, %v2800_v62  ;;  %v407_v35 = vadd.f32 0.7978846, %v391_v19  ;;  %v408_v36 = vadd.f32 0.7978846, %v392_v16 }
 0x15b   :  { %486 = vst [vmem:[#allocation2 + $0x81] sm:$0xff] %v2811_v6  ;;  %v409_v41 = vadd.f32 0.7978846, %v393_v24  ;;  %v2250_v50 = vpop.eup %2249  ;;  %v410_v56 = vadd.f32 0.7978846, %v394_v31  ;;  %v422_v1 = vmul.f32 %v406_v25, %v2757_v40  ;;  %v2841_v40 = vmul.f32 %v2674_v52, %v2788_v37 }
 0x15c   :  { %v411_v58 = vadd.f32 0.7978846, %v395_v14  ;;  %v412_v61 = vadd.f32 0.7978846, %v396_v29  ;;  %v413_v47 = vadd.f32 0.7978846, %v397_v17  ;;  %v423_v51 = vmul.f32 %v407_v35, %v2759_v48 }
 0x15d   :  { %v424_v3 = vmul.f32 %v408_v36, %v2761_v11  ;;  %v425_v4 = vmul.f32 %v409_v41, %v2763_v46  ;;  %v510_v60 = vld [vmem:[#allocation2 + $0x42] sm:$0x1]  ;;  %v550_v2 = vld [vmem:[#allocation2 + $0x47] sm:$0x1]  ;;  %v426_v12 = vmul.f32 %v410_v56, %v2765_v15  ;;  %2251 = vtanh.f32 %v422_v1 }
 0x15e   :  { %v427_v19 = vmul.f32 %v411_v58, %v2767_v23  ;;  %v511_v16 = vld [vmem:[#allocation2 + $0x52] sm:$0x1]  ;;  %530 = vst [vmem:[#allocation2 + $0x40] sm:$0x1] %v510_v60  ;;  %v551_v24 = vld [vmem:[#allocation2 + $0x57] sm:$0x1]  ;;  %v428_v14 = vmul.f32 %v412_v61, %v2769_v44  ;;  %2253 = vtanh.f32 %v423_v51  ;;  %v429_v15 = vmul.f32 %v413_v47, %v2771_v45 }
 0x15f   :  { %570 = vst [vmem:[#allocation2 + $0x49] sm:$0x1] %v550_v2  ;;  %v512_v48 = vld [vmem:[#allocation2 + $0x62] sm:$0x1]  ;;  %v552_v31 = vld [vmem:[#allocation2 + $0x67] sm:$0x1]  ;;  %2255 = vtanh.f32 %v424_v3  ;;  %v647_v35 = vmul.f32 %v2674_v52, %v2796_v54  ;;  %v2851_v45 = vmul.f32 %v2674_v52, %v2805_v9  ;;  %v2872_v58 = vmul.f32 %v2684_v57, %v2800_v62 }
 0x160   :  { %v446_v46 = vadd.f32 1.0, %v2246_v5  ;;  %v447_v29 = vadd.f32 1.0, %v2248_v63  ;;  %531 = vst [vmem:[#allocation2 + $0x50] sm:$0x1] %v511_v16  ;;  %571 = vst [vmem:[#allocation2 + $0x59] sm:$0x1] %v551_v24  ;;  %2257 = vtanh.f32 %v425_v4  ;;  %v2895_v60 = vmul.f32 %v2684_v57, %v2805_v9 }
 0x161   :  { %532 = vst [vmem:[#allocation2 + $0x60] sm:$0x1] %v512_v48  ;;  %572 = vst [vmem:[#allocation2 + $0x69] sm:$0x1] %v552_v31  ;;  %v448_v23 = vadd.f32 1.0, %v2250_v50  ;;  %2259 = vtanh.f32 %v426_v12  ;;  %v2899_v2 = vmul.f32 %v2684_v57, %v2811_v6 }
 0x162   :  { %v513_v17 = vld [vmem:[#allocation2 + $0x72] sm:$0x1]  ;;  %v462_v36 = vmul.f32 %v446_v46, %v2741_v10  ;;  %v463_v44 = vmul.f32 %v447_v29, %v2755_v28  ;;  %v514_v5 = vld [vmem:[#allocation2 + $0x82] sm:$0x1]  ;;  %v553_v63 = vld [vmem:[#allocation2 + $0x77] sm:$0x1]  ;;  %v2858_v10 = vmul.f32 %v2684_v57, %v2788_v37  ;;  %v2862_v28 = vmul.f32 %v2684_v57, %v2796_v54 }
 0x163   :  { %v515_v25 = vld [vmem:[#allocation2 + $0x92] sm:$0x1]  ;;  %533 = vst [vmem:[#allocation2 + $0x70] sm:$0x1] %v513_v17  ;;  %v554_v41 = vld [vmem:[#allocation2 + $0x87] sm:$0x1]  ;;  %v2854_v50 = vmul.f32 %v448_v23, %v2777_v22  ;;  %2261 = vtanh.f32 %v427_v19 }
 0x164   :  { %535 = vst [vmem:[#allocation2 + $0x90] sm:$0x1] %v515_v25  ;;  %534 = vst [vmem:[#allocation2 + $0x80] sm:$0x1] %v514_v5  ;;  %v555_v56 = vld [vmem:[#allocation2 + $0x97] sm:$0x1]  ;;  %v2865_v12 = vmul.f32 %v2674_v52, %v463_v44  ;;  %v2868_v22 = vmul.f32 %v2674_v52, %v462_v36  ;;  %2263 = vtanh.f32 %v428_v14  ;;  %v2880_v1 = vmul.f32 %v2684_v57, %v462_v36 }
 0x165   :  { %573 = vst [vmem:[#allocation2 + $0x79] sm:$0x1] %v553_v63  ;;  %574 = vst [vmem:[#allocation2 + $0x89] sm:$0x1] %v554_v41  ;;  %v2877_v61 = vmul.f32 %v2674_v52, %v2854_v50  ;;  %v2883_v47 = vmul.f32 %v2684_v57, %v463_v44  ;;  %2265 = vtanh.f32 %v429_v15  ;;  %v2885_v51 = vld [vmem:[#allocation2 + $0x40] sm:$0xff]  ;;  %v2891_v4 = vmul.f32 %v2684_v57, %v2854_v50 }
 0x166   :  { %479 = vst [vmem:[#allocation2 + $0x11] sm:$0xff] %v462_v36  ;;  %480 = vst [vmem:[#allocation2 + $0x21] sm:$0xff] %v463_v44  ;;  %v2887_v3 = vld [vmem:[#allocation2 + $0x42] sm:$0xff]  ;;  %v610_v16 = vmul.f32 %v2701_v18, %v2885_v51  ;;  %v2911_v31 = vmul.f32 %v2705_v20, %v2885_v51  ;;  %v2914_v14 = vmul.f32 %v2690_v0, %v463_v44 }
 0x167   :  { %498 = vst [vmem:[#allocation2 + $0x1] sm:$0xff] %v463_v44  ;;  %575 = vst [vmem:[#allocation2 + $0x99] sm:$0x1] %v555_v56  ;;  %v2901_v19 = vld [vmem:[#allocation2 + $0x50] sm:$0xff]  ;;  %v698_v48 = vmul.f32 %v2747_v59, %v2887_v3  ;;  %v2928_v25 = vmul.f32 %v2715_v38, %v2887_v3  ;;  %v2252_v36 = vpop.eup %2251 }
 0x168   :  { %481 = vst [vmem:[#allocation2 + $0x31] sm:$0xff] %v2854_v50  ;;  %3708 = vst [vmem:[#allocation25_spill] sm:$0xff] %v2887_v3  ;;  %v2905_v24 = vld [vmem:[#allocation2 + $0x52] sm:$0xff]  ;;  %v2916_v46 = vld [vmem:[#allocation2 + $0x60] sm:$0xff]  ;;  %v611_v15 = vmul.f32 %v2701_v18, %v2901_v19  ;;  %v750_v17 = vmul.f32 %v2705_v20, %v2901_v19  ;;  %v662_v63 = vadd.f32 %v2841_v40, %v610_v16  ;;  %v2941_v13 = vpop.eup %2253  ;;  %v454_v7 = vadd.f32 1.0, %v2252_v36 }
 0x169   :  { %3709 = vst [vmem:[#allocation26_spill] sm:$0xff] %v2905_v24  ;;  %3710 = vst [vmem:[#allocation27_spill] sm:$0xff] %v2914_v14  ;;  %v2918_v29 = vld [vmem:[#allocation2 + $0x62] sm:$0xff]  ;;  %v699_v23 = vmul.f32 %v2747_v59, %v2905_v24  ;;  %v612_v44 = vmul.f32 %v2701_v18, %v2916_v46  ;;  %v2939_v56 = vmul.f32 %v2715_v38, %v2905_v24  ;;  %v2951_v16 = vpop.eup %2255 }
 0x16a   :  { %v2932_v5 = vld [vmem:[#allocation2 + $0x70] sm:$0xff]  ;;  %v700_v41 = vmul.f32 %v2747_v59, %v2918_v29  ;;  %3711 = vst [vmem:[#allocation28_spill] sm:$0xff] %v2941_v13  ;;  %v663_v53 = vadd.f32 %v647_v35, %v611_v15  ;;  %v751_v40 = vmul.f32 %v2705_v20, %v2916_v46  ;;  %3712 = vst [vmem:[#allocation29_spill] sm:$0xff] %v2951_v16  ;;  %v2258_v15 = vpop.eup %2257 }
 0x16b   :  { %v613_v26 = vmul.f32 %v2701_v18, %v2932_v5  ;;  %v2947_v27 = vld [vmem:[#allocation2 + $0x80] sm:$0xff]  ;;  %v664_v24 = vadd.f32 %v2831_v30, %v612_v44  ;;  %v714_v13 = vadd.f32 %v698_v48, %v662_v63  ;;  %v752_v35 = vmul.f32 %v2705_v20, %v2932_v5  ;;  %v2260_v48 = vpop.eup %2259 }
 0x16c   :  { %v2945_v55 = vld [vmem:[#allocation2 + $0x72] sm:$0xff]  ;;  %v2959_v3 = vmul.f32 %v454_v7, %v2774_v21  ;;  %v715_v30 = vadd.f32 %v699_v23, %v663_v53  ;;  %v753_v44 = vmul.f32 %v2705_v20, %v2947_v27  ;;  %v457_v63 = vadd.f32 1.0, %v2258_v15 }
 0x16d   :  { %v507_v32 = vld [vmem:[#allocation2 + $0x12] sm:$0x1]  ;;  %v508_v11 = vld [vmem:[#allocation2 + $0x22] sm:$0x1]  ;;  %v701_v36 = vmul.f32 %v2747_v59, %v2945_v55  ;;  %v547_v14 = vld [vmem:[#allocation2 + $0x17] sm:$0x1]  ;;  %v665_v6 = vadd.f32 %v2851_v45, %v613_v26  ;;  %v716_v7 = vadd.f32 %v700_v41, %v664_v24  ;;  %v766_v21 = vadd.f32 %v750_v17, %v714_v13 }
 0x16e   :  { %v506_v57 = vld [vmem:[#allocation2 + $0x2] sm:$0x1]  ;;  %527 = vst [vmem:[#allocation2 + $0x10] sm:$0x1] %v507_v32  ;;  %528 = vst [vmem:[#allocation2 + $0x20] sm:$0x1] %v508_v11  ;;  %v2262_v11 = vpop.eup %2261  ;;  %v767_v53 = vadd.f32 %v751_v40, %v715_v30  ;;  %v473_v13 = vmul.f32 %v457_v63, %v2783_v33 }
 0x16f   :  { %v509_v49 = vld [vmem:[#allocation2 + $0x32] sm:$0x1]  ;;  %526 = vst [vmem:[#allocation2] sm:$0x1] %v506_v57  ;;  %v546_v16 = vld [vmem:[#allocation2 + $0x7] sm:$0x1]  ;;  %v855_v57 = vmul.f32 %v2715_v38, %v2918_v29  ;;  %v717_v26 = vadd.f32 %v701_v36, %v665_v6  ;;  %v2264_v23 = vpop.eup %2263  ;;  %v768_v24 = vadd.f32 %v752_v35, %v716_v7  ;;  %v818_v17 = vadd.f32 %v2862_v28, %v766_v21 }
 0x170   :  { %529 = vst [vmem:[#allocation2 + $0x30] sm:$0x1] %v509_v49  ;;  %v548_v9 = vld [vmem:[#allocation2 + $0x27] sm:$0x1]  ;;  %v549_v54 = vld [vmem:[#allocation2 + $0x37] sm:$0x1]  ;;  %v856_v49 = vmul.f32 %v2715_v38, %v2945_v55  ;;  %v2266_v41 = vpop.eup %2265 }
 0x171   :  { %566 = vst [vmem:[#allocation2 + $0x9] sm:$0x1] %v546_v16  ;;  %567 = vst [vmem:[#allocation2 + $0x19] sm:$0x1] %v547_v14  ;;  %v458_v32 = vadd.f32 1.0, %v2260_v48  ;;  %v2967_v45 = vld [vmem:[#allocation2 + $0x82] sm:$0xff]  ;;  %v820_v36 = vadd.f32 %v2895_v60, %v768_v24 }
 0x172   :  { %487 = vst [vmem:[#allocation2 + $0xb1] sm:$0xff] %v2959_v3  ;;  %568 = vst [vmem:[#allocation2 + $0x29] sm:$0x1] %v548_v9  ;;  %v459_v14 = vadd.f32 1.0, %v2262_v11  ;;  %v460_v16 = vadd.f32 1.0, %v2264_v23  ;;  %v769_v9 = vadd.f32 %v753_v44, %v717_v26  ;;  %v461_v6 = vadd.f32 1.0, %v2266_v41 }
 0x173   :  { %569 = vst [vmem:[#allocation2 + $0x39] sm:$0x1] %v549_v54  ;;  %v474_v15 = vmul.f32 %v458_v32, %v2786_v34  ;;  %v819_v54 = vadd.f32 %v2872_v58, %v767_v53  ;;  %490 = vst [vmem:[#allocation2 + $0xe1] sm:$0xff] %v473_v13  ;;  %v857_v33 = vmul.f32 %v2715_v38, %v2967_v45 }
 0x174   :  { %v2976_v40 = vmul.f32 %v459_v14, %v2791_v39  ;;  %v2982_v35 = vmul.f32 %v460_v16, %v2794_v42  ;;  %v821_v28 = vadd.f32 %v2899_v2, %v769_v9  ;;  %v2986_v34 = vadd.f32 %v2939_v56, %v818_v17 }
 0x175   :  { %491 = vst [vmem:[#allocation2 + $0xf1] sm:$0xff] %v474_v15  ;;  %v2988_v58 = vadd.f32 %v855_v57, %v819_v54  ;;  %v477_v39 = vmul.f32 %v461_v6, %v2815_v8  ;;  %v587_v44 = vld [vmem:[#allocation2 + $0x10] sm:$0xff]  ;;  %v588_v42 = vld [vmem:[#allocation2 + $0x20] sm:$0xff]  ;;  %v2996_v48 = vadd.f32 %v856_v49, %v820_v36  ;;  %v3000_v2 = vmul.f32 %v2720_v43, %v2885_v51 }
 0x176   :  { %492 = vst [vmem:[#allocation2 + $0x101] sm:$0xff] %v2976_v40  ;;  %v2994_v60 = vmul.f32 %v2674_v52, %v2976_v40  ;;  %v586_v30 = vld [vmem:[#allocation2] sm:$0xff]  ;;  %493 = vst [vmem:[#allocation2 + $0x111] sm:$0xff] %v2982_v35  ;;  %v607_v63 = vmul.f32 %v2701_v18, %v587_v44  ;;  %v608_v7 = vmul.f32 %v2701_v18, %v588_v42 }
 0x177   :  { %v589_v56 = vld [vmem:[#allocation2 + $0x30] sm:$0xff]  ;;  %v606_v8 = vmul.f32 %v2701_v18, %v586_v30  ;;  %v3008_v11 = vmul.f32 %v2720_v43, %v2901_v19  ;;  %505 = vst [vmem:[#allocation2 + $0x131] sm:$0xff] %v2982_v35  ;;  %494 = vst [vmem:[#allocation2 + $0x121] sm:$0xff] %v477_v39  ;;  %v746_v23 = vmul.f32 %v2705_v20, %v587_v44 }
 0x178   :  { %v674_v21 = vld [vmem:[#allocation2 + $0x2] sm:$0xff]  ;;  %v675_v57 = vld [vmem:[#allocation2 + $0x12] sm:$0xff]  ;;  %v609_v51 = vmul.f32 %v2701_v18, %v589_v56  ;;  %v659_v19 = vadd.f32 %v2868_v22, %v607_v63  ;;  %v660_v24 = vadd.f32 %v2865_v12, %v608_v7  ;;  %v747_v9 = vmul.f32 %v2705_v20, %v588_v42 }
 0x179   :  { %v3012_v32 = vld [vmem:[#allocation2 + $0x22] sm:$0xff]  ;;  %v694_v53 = vmul.f32 %v2747_v59, %v674_v21  ;;  %v695_v49 = vmul.f32 %v2747_v59, %v675_v57  ;;  %v517_v14 = vld [vmem:[#allocation2 + $0xb2] sm:$0x1]  ;;  %v658_v13 = vadd.f32 %v2865_v12, %v606_v8  ;;  %v557_v41 = vld [vmem:[#allocation2 + $0xb7] sm:$0x1]  ;;  %v748_v54 = vmul.f32 %v2705_v20, %v589_v56 }
 0x17a   :  { %v3014_v26 = vld [vmem:[#allocation2 + $0x32] sm:$0xff]  ;;  %v696_v17 = vmul.f32 %v2747_v59, %v3012_v32  ;;  %537 = vst [vmem:[#allocation2 + $0xb0] sm:$0x1] %v517_v14  ;;  %v661_v16 = vadd.f32 %v2877_v61, %v609_v51  ;;  %577 = vst [vmem:[#allocation2 + $0xb9] sm:$0x1] %v557_v41  ;;  %v850_v12 = vmul.f32 %v2715_v38, %v675_v57 }
 0x17b   :  { %v697_v15 = vmul.f32 %v2747_v59, %v3014_v26  ;;  %v710_v6 = vadd.f32 %v694_v53, %v658_v13  ;;  %v711_v36 = vadd.f32 %v695_v49, %v659_v19  ;;  %v520_v39 = vld [vmem:[#allocation2 + $0xe2] sm:$0x1]  ;;  %v560_v30 = vld [vmem:[#allocation2 + $0xe7] sm:$0x1]  ;;  %v851_v8 = vmul.f32 %v2715_v38, %v3012_v32  ;;  %v889_v57 = vld [vmem:[#allocation2 + $0x90] sm:$0xff] }
 0x17c   :  { %v712_v22 = vadd.f32 %v696_v17, %v660_v24  ;;  %v852_v61 = vmul.f32 %v2715_v38, %v3014_v26  ;;  %v873_v63 = vadd.f32 %v857_v33, %v821_v28  ;;  %v521_v7 = vld [vmem:[#allocation2 + $0xf2] sm:$0x1]  ;;  %540 = vst [vmem:[#allocation2 + $0xe0] sm:$0x1] %v520_v39  ;;  %v561_v21 = vld [vmem:[#allocation2 + $0xf7] sm:$0x1]  ;;  %v902_v19 = vmul.f32 %v2720_v43, %v588_v42 }
 0x17d   :  { %v713_v44 = vadd.f32 %v697_v15, %v661_v16  ;;  %580 = vst [vmem:[#allocation2 + $0xe9] sm:$0x1] %v560_v30  ;;  %v522_v51 = vld [vmem:[#allocation2 + $0x102] sm:$0x1]  ;;  %v562_v53 = vld [vmem:[#allocation2 + $0x107] sm:$0x1]  ;;  %v762_v49 = vadd.f32 %v746_v23, %v710_v6  ;;  %v763_v14 = vadd.f32 %v747_v9, %v711_v36  ;;  %v903_v33 = vmul.f32 %v2720_v43, %v589_v56 }
 0x17e   :  { %v764_v13 = vadd.f32 %v748_v54, %v712_v22  ;;  %541 = vst [vmem:[#allocation2 + $0xf0] sm:$0x1] %v521_v7  ;;  %581 = vst [vmem:[#allocation2 + $0xf9] sm:$0x1] %v561_v21  ;;  %v906_v28 = vmul.f32 %v2720_v43, %v2916_v46  ;;  %v907_v17 = vmul.f32 %v2720_v43, %v2932_v5  ;;  %v523_v23 = vld [vmem:[#allocation2 + $0x112] sm:$0x1] }
 0x17f   :  { %542 = vst [vmem:[#allocation2 + $0x100] sm:$0x1] %v522_v51  ;;  %582 = vst [vmem:[#allocation2 + $0x109] sm:$0x1] %v562_v53  ;;  %v765_v24 = vadd.f32 %v2911_v31, %v713_v44  ;;  %v525_v41 = vld [vmem:[#allocation2 + $0x132] sm:$0x1]  ;;  %v814_v15 = vadd.f32 %v2880_v1, %v762_v49  ;;  %v815_v42 = vadd.f32 %v2883_v47, %v763_v14 }
 0x180   :  { %v563_v16 = vld [vmem:[#allocation2 + $0x117] sm:$0x1]  ;;  %v816_v9 = vadd.f32 %v2891_v4, %v764_v13  ;;  %v908_v31 = vmul.f32 %v2720_v43, %v2947_v27  ;;  %v524_v54 = vld [vmem:[#allocation2 + $0x122] sm:$0x1]  ;;  %543 = vst [vmem:[#allocation2 + $0x110] sm:$0x1] %v523_v23  ;;  %v909_v6 = vmul.f32 %v2720_v43, %v889_v57  ;;  %v922_v36 = vadd.f32 %v906_v28, %v2986_v34 }
 0x181   :  { %545 = vst [vmem:[#allocation2 + $0x130] sm:$0x1] %v525_v41  ;;  %v564_v56 = vld [vmem:[#allocation2 + $0x127] sm:$0x1]  ;;  %v565_v46 = vld [vmem:[#allocation2 + $0x137] sm:$0x1]  ;;  %v817_v5 = vadd.f32 %v2858_v10, %v765_v24  ;;  %v923_v1 = vadd.f32 %v907_v17, %v2988_v58  ;;  %v866_v47 = vadd.f32 %v850_v12, %v814_v15  ;;  %v867_v4 = vadd.f32 %v851_v8, %v815_v42 }
 0x182   :  { %583 = vst [vmem:[#allocation2 + $0x119] sm:$0x1] %v563_v16  ;;  %544 = vst [vmem:[#allocation2 + $0x120] sm:$0x1] %v524_v54  ;;  %v868_v27 = vadd.f32 %v852_v61, %v816_v9  ;;  %v924_v22 = vadd.f32 %v908_v31, %v2996_v48  ;;  %v925_v30 = vadd.f32 %v909_v6, %v873_v63  ;;  %v3713_v61 = vld [vmem:[#allocation22_spill] sm:$0xff]  ;;  %v3715_v21 = vld [vmem:[#allocation24_spill] sm:$0xff] }
 0x183   :  { %584 = vst [vmem:[#allocation2 + $0x129] sm:$0x1] %v564_v56  ;;  %585 = vst [vmem:[#allocation2 + $0x139] sm:$0x1] %v565_v46  ;;  %v869_v39 = vadd.f32 %v2928_v25, %v817_v5  ;;  %v955_v10 = vmul.f32 %v2690_v0, %v2854_v50  ;;  %v956_v44 = vmul.f32 %v2690_v0, %v2788_v37  ;;  %v3714_v25 = vld [vmem:[#allocation23_spill] sm:$0xff]  ;;  %v3718_v23 = vld [vmem:[#allocation25_spill] sm:$0xff] }
 0x184   :  { %v918_v34 = vadd.f32 %v902_v19, %v866_v47  ;;  %v919_v7 = vadd.f32 %v903_v33, %v867_v4  ;;  %v920_v58 = vadd.f32 %v3000_v2, %v868_v27  ;;  %v958_v12 = vmul.f32 %v2690_v0, %v2800_v62  ;;  %v3716_v37 = vld [vmem:[#allocation27_spill] sm:$0xff]  ;;  %v3717_v19 = vld [vmem:[#allocation18_spill] sm:$0xff] }
 0x185   :  { %v921_v8 = vadd.f32 %v3008_v11, %v869_v39  ;;  %v957_v48 = vmul.f32 %v2690_v0, %v3713_v61  ;;  %v959_v63 = vmul.f32 %v2690_v0, %v3714_v25  ;;  %v960_v50 = vmul.f32 %v2690_v0, %v3715_v21  ;;  %v993_v11 = vld [vmem:[#allocation2 + $0x92] sm:$0xff]  ;;  %v3719_v15 = vld [vmem:[#allocation26_spill] sm:$0xff]  ;;  %v3114_v39 = vld [vmem:[#allocation2 + $0xe0] sm:$0xff] }
 0x186   :  { %v600_v51 = vld [vmem:[#allocation2 + $0x100] sm:$0xff]  ;;  %v970_v53 = vadd.f32 %v3716_v37, %v918_v34  ;;  %v971_v49 = vadd.f32 %v955_v10, %v919_v7  ;;  %v972_v14 = vadd.f32 %v956_v44, %v920_v58  ;;  %v974_v2 = vadd.f32 %v958_v12, %v922_v36  ;;  %v595_v12 = vld [vmem:[#allocation2 + $0xb0] sm:$0xff] }
 0x187   :  { %v620_v13 = vmul.f32 %v2701_v18, %v600_v51  ;;  %v973_v62 = vadd.f32 %v957_v48, %v921_v8  ;;  %v975_v57 = vadd.f32 %v959_v63, %v923_v1  ;;  %v1006_v24 = vmul.f32 %v3717_v19, %v3012_v32  ;;  %v3118_v10 = vld [vmem:[#allocation2 + $0x110] sm:$0xff]  ;;  %v3728_v48 = vld [vmem:[#allocation28_spill] sm:$0xff] }
 0x188   :  { %v976_v33 = vadd.f32 %v960_v50, %v924_v22  ;;  %v977_v28 = vadd.f32 %v959_v63, %v925_v30  ;;  %v1007_v17 = vmul.f32 %v3717_v19, %v3014_v26  ;;  %v1008_v41 = vmul.f32 %v3717_v19, %v3718_v23  ;;  %v3116_v30 = vld [vmem:[#allocation2 + $0xf0] sm:$0xff]  ;;  %v3729_v63 = vld [vmem:[#allocation29_spill] sm:$0xff] }
 0x189   :  { %v3075_v16 = vadd.f32 %v2994_v60, %v620_v13  ;;  %v1009_v42 = vmul.f32 %v3717_v19, %v3719_v15  ;;  %v1010_v9 = vmul.f32 %v3717_v19, %v2918_v29  ;;  %v1011_v32 = vmul.f32 %v3717_v19, %v2945_v55  ;;  %v3725_v29 = vld [vmem:[#allocation20_spill] sm:$0xff]  ;;  %v3131_v50 = vld [vmem:[#allocation2 + $0xe1] sm:$0xff] }
 0x18a   :  { %v1012_v31 = vmul.f32 %v3717_v19, %v2967_v45  ;;  %v1013_v26 = vmul.f32 %v3717_v19, %v993_v11  ;;  %v3086_v54 = vadd.f32 %v1006_v24, %v970_v53  ;;  %v3088_v56 = vadd.f32 %v1007_v17, %v971_v49  ;;  %v3135_v37 = vld [vmem:[#allocation2 + $0x111] sm:$0xff] }
 0x18b   :  { %v3090_v60 = vadd.f32 %v1008_v41, %v972_v14  ;;  %v3092_v46 = vadd.f32 %v1009_v42, %v973_v62  ;;  %v3094_v5 = vadd.f32 %v1010_v9, %v974_v2  ;;  %v3096_v6 = vadd.f32 %v1011_v32, %v975_v57  ;;  %v3730_v62 = vld [vmem:[#allocation21_spill] sm:$0xff]  ;;  %v3159_v15 = vld [vmem:[#allocation2 + $0xf2] sm:$0xff] }
 0x18c   :  { %3720 = vst [vmem:[#allocation22_spill] sm:$0xff] %v3088_v56  ;;  %v360_v36 = vmul.f32 0.5, %v3725_v29  ;;  %v3099_v55 = vadd.f32 %v1012_v31, %v976_v33  ;;  %v1038_v45 = vadd.f32 %v3088_v56, %v3086_v54  ;;  %v1066_v1 = vmul.f32 %v3086_v54, %v3086_v54  ;;  %v3157_v41 = vld [vmem:[#allocation2 + $0xe2] sm:$0xff]  ;;  %v3172_v29 = vld [vmem:[#allocation2 + $0x112] sm:$0xff] }
 0x18d   :  { %3721 = vst [vmem:[#allocation23_spill] sm:$0xff] %v3090_v60  ;;  %3722 = vst [vmem:[#allocation24_spill] sm:$0xff] %v3092_v46  ;;  %v3106_v47 = vmul.f32 %v2705_v20, %v600_v51  ;;  %v3108_v4 = vadd.f32 %v1013_v26, %v977_v28  ;;  %v1067_v27 = vmul.f32 %v3088_v56, %v3088_v56  ;;  %v455_v25 = vadd.f32 1.0, %v3728_v48  ;;  %v3133_v51 = vld [vmem:[#allocation2 + $0xf1] sm:$0xff]  ;;  %v688_v42 = vld [vmem:[#allocation2 + $0x102] sm:$0xff] }
 0x18e   :  { %3723 = vst [vmem:[#allocation27_spill] sm:$0xff] %v3094_v5  ;;  %3724 = vst [vmem:[#allocation18_spill] sm:$0xff] %v3096_v6  ;;  %v1068_v22 = vmul.f32 %v3090_v60, %v3090_v60  ;;  %v1039_v44 = vadd.f32 %v1038_v45, %v3090_v60  ;;  %v1069_v34 = vmul.f32 %v3092_v46, %v3092_v46  ;;  %v456_v21 = vadd.f32 1.0, %v3729_v63 }
 0x18f   :  { %3726 = vst [vmem:[#allocation25_spill] sm:$0xff] %v3099_v55  ;;  %3727 = vst [vmem:[#allocation26_spill] sm:$0xff] %v3108_v4  ;;  %v1070_v7 = vmul.f32 %v3094_v5, %v3094_v5  ;;  %v1071_v58 = vmul.f32 %v3096_v6, %v3096_v6  ;;  %v1072_v8 = vmul.f32 %v3099_v55, %v3099_v55 }
 0x190   :  { %v1082_v61 = vadd.f32 %v1067_v27, %v1066_v1  ;;  %v1040_v53 = vadd.f32 %v1039_v44, %v3092_v46  ;;  %v618_v49 = vmul.f32 %v2701_v18, %v3114_v39  ;;  %v619_v14 = vmul.f32 %v2701_v18, %v3116_v30 }
 0x191   :  { %v621_v2 = vmul.f32 %v2701_v18, %v3118_v10  ;;  %v3145_v57 = vmul.f32 %v455_v25, %v3730_v62  ;;  %v3147_v11 = vmul.f32 %v456_v21, %v360_v36  ;;  %v615_v24 = vmul.f32 %v2701_v18, %v595_v12 }
 0x192   :  { %v1083_v13 = vadd.f32 %v1082_v61, %v1068_v22  ;;  %v1041_v33 = vadd.f32 %v1040_v53, %v3094_v5  ;;  %v654_v28 = vmul.f32 %v2674_v52, %v3131_v50  ;;  %v655_v17 = vmul.f32 %v2674_v52, %v3133_v51  ;;  %v3175_v22 = vld [vmem:[#allocation2 + $0xb2] sm:$0xff]  ;;  %v3189_v53 = vld [vmem:[#allocation2 + $0x120] sm:$0xff] }
 0x193   :  { %v657_v23 = vmul.f32 %v2674_v52, %v3135_v37  ;;  %v1073_v9 = vmul.f32 %v3108_v4, %v3108_v4  ;;  %488 = vst [vmem:[#allocation2 + $0xc1] sm:$0xff] %v3145_v57  ;;  %489 = vst [vmem:[#allocation2 + $0xd1] sm:$0xff] %v3147_v11  ;;  %v3168_v31 = vmul.f32 %v2674_v52, %v3145_v57 }
 0x194   :  { %v1084_v32 = vadd.f32 %v1083_v13, %v1069_v34  ;;  %499 = vst [vmem:[#allocation2 + $0xa1] sm:$0xff] %v3145_v57  ;;  %v651_v26 = vmul.f32 %v2674_v52, %v2959_v3  ;;  %v1042_v36 = vadd.f32 %v1041_v33, %v3096_v6  ;;  %v670_v45 = vadd.f32 %v654_v28, %v618_v49 }
 0x195   :  { %v671_v1 = vadd.f32 %v655_v17, %v619_v14  ;;  %v673_v27 = vadd.f32 %v657_v23, %v621_v2  ;;  %v3179_v34 = vmul.f32 %v2674_v52, %v3147_v11  ;;  %v706_v61 = vmul.f32 %v2747_v59, %v3157_v41  ;;  %v786_v23 = vld [vmem:[#allocation2 + $0xb1] sm:$0xff] }
 0x196   :  { %v1085_v44 = vadd.f32 %v1084_v32, %v1070_v7  ;;  %v707_v3 = vmul.f32 %v2747_v59, %v3159_v15  ;;  %v1043_v48 = vadd.f32 %v1042_v36, %v3099_v55  ;;  %v667_v25 = vadd.f32 %v651_v26, %v615_v24 }
 0x197   :  { %v708_v63 = vmul.f32 %v2747_v59, %v688_v42  ;;  %v709_v21 = vmul.f32 %v2747_v59, %v3172_v29  ;;  %v703_v52 = vmul.f32 %v2747_v59, %v3175_v22  ;;  %v722_v49 = vadd.f32 %v706_v61, %v670_v45 }
 0x198   :  { %v1086_v7 = vadd.f32 %v1085_v44, %v1071_v58  ;;  %v723_v14 = vadd.f32 %v707_v3, %v671_v1  ;;  %v1044_v2 = vadd.f32 %v1043_v48, %v3108_v4  ;;  %v3196_v24 = vmul.f32 %v2705_v20, %v595_v12 }
 0x199   :  { %v724_v13 = vadd.f32 %v708_v63, %v3075_v16  ;;  %v725_v62 = vadd.f32 %v709_v21, %v673_v27  ;;  %v758_v28 = vmul.f32 %v2705_v20, %v3116_v30  ;;  %v760_v58 = vmul.f32 %v2705_v20, %v3118_v10  ;;  %v3731_v21 = vld [vmem:[#allocation17_spill] sm:$0xff] }
 0x19a   :  { %v1087_v33 = vadd.f32 %v1086_v7, %v1072_v8  ;;  %v761_v17 = vmul.f32 %v2705_v20, %v3189_v53  ;;  %v1045_v42 = vrot.slane %v1044_v2, 4  ;;  %v518_v26 = vld [vmem:[#allocation2 + $0xc2] sm:$0x1]  ;;  %v3204_v36 = vadd.f32 %v703_v52, %v667_v25  ;;  %v519_v1 = vld [vmem:[#allocation2 + $0xd2] sm:$0x1] }
 0x19b   :  { %v516_v32 = vld [vmem:[#allocation2 + $0xa2] sm:$0x1]  ;;  %v3208_v16 = vmul.f32 %v2705_v20, %v3114_v39  ;;  %v775_v12 = vadd.f32 %v3106_v47, %v723_v14  ;;  %538 = vst [vmem:[#allocation2 + $0xc0] sm:$0x1] %v518_v26  ;;  %v556_v27 = vld [vmem:[#allocation2 + $0xa7] sm:$0x1]  ;;  %v774_v61 = vadd.f32 %v758_v28, %v722_v49  ;;  %v776_v3 = vadd.f32 %v760_v58, %v724_v13 }
 0x19c   :  { %v3211_v8 = vld [vmem:[#allocation2 + $0x121] sm:$0xff]  ;;  %v1088_v45 = vadd.f32 %v1087_v33, %v1073_v9  ;;  %536 = vst [vmem:[#allocation2 + $0xa0] sm:$0x1] %v516_v32  ;;  %v777_v48 = vadd.f32 %v761_v17, %v725_v62  ;;  %v1046_v63 = vadd.f32 %v1045_v42, %v1044_v2  ;;  %539 = vst [vmem:[#allocation2 + $0xd0] sm:$0x1] %v519_v1 }
 0x19d   :  { %v558_v44 = vld [vmem:[#allocation2 + $0xc7] sm:$0x1]  ;;  %v559_v25 = vld [vmem:[#allocation2 + $0xd7] sm:$0x1]  ;;  %576 = vst [vmem:[#allocation2 + $0xa9] sm:$0x1] %v556_v27  ;;  %v3214_v7 = vmul.f32 %v3731_v21, %v786_v23  ;;  %v807_v47 = vmul.f32 %v3731_v21, %v3145_v57  ;;  %v810_v9 = vmul.f32 %v3731_v21, %v3133_v51  ;;  %v811_v49 = vmul.f32 %v3731_v21, %v2976_v40 }
 0x19e   :  { %578 = vst [vmem:[#allocation2 + $0xc9] sm:$0x1] %v558_v44  ;;  %v1089_v52 = vrot.slane %v1088_v45, 4  ;;  %579 = vst [vmem:[#allocation2 + $0xd9] sm:$0x1] %v559_v25  ;;  %v812_v14 = vmul.f32 %v3731_v21, %v3135_v37  ;;  %v813_v2 = vmul.f32 %v3731_v21, %v3211_v8  ;;  %v3226_v13 = vld [vmem:[#allocation2 + $0x102] sm:$0xff]  ;;  %v808_v33 = vmul.f32 %v3731_v21, %v3147_v11 }
 0x19f   :  { %v1047_v62 = vrot.slane %v1046_v63, 2  ;;  %v809_v28 = vmul.f32 %v3731_v21, %v3131_v50  ;;  %v826_v58 = vadd.f32 %v810_v9, %v774_v61  ;;  %v3232_v17 = vld [vmem:[#allocation2 + $0x122] sm:$0xff]  ;;  %v827_v40 = vadd.f32 %v811_v49, %v775_v12 }
 0x1a0   :  { %v1090_v23 = vadd.f32 %v1089_v52, %v1088_v45  ;;  %v828_v42 = vadd.f32 %v812_v14, %v776_v3  ;;  %v829_v32 = vadd.f32 %v813_v2, %v777_v48  ;;  %v858_v1 = vmul.f32 %v2715_v38, %v3175_v22 }
 0x1a1   :  { %v1048_v26 = vadd.f32 %v1047_v62, %v1046_v63  ;;  %v863_v27 = vmul.f32 %v2715_v38, %v3226_v13  ;;  %v864_v44 = vmul.f32 %v2715_v38, %v3172_v29  ;;  %v861_v61 = vmul.f32 %v2715_v38, %v3157_v41 }
 0x1a2   :  { %v1091_v25 = vrot.slane %v1090_v23, 2  ;;  %v862_v45 = vmul.f32 %v2715_v38, %v3159_v15  ;;  %v865_v12 = vmul.f32 %v2715_v38, %v3232_v17  ;;  %v596_v63 = vld [vmem:[#allocation2 + $0xc0] sm:$0xff]  ;;  %v912_v9 = vmul.f32 %v2720_v43, %v3114_v39 }
 0x1a3   :  { %v1049_v3 = vrot.slane %v1048_v26, 1  ;;  %v594_v48 = vld [vmem:[#allocation2 + $0xa0] sm:$0xff]  ;;  %v879_v22 = vadd.f32 %v863_v27, %v827_v40  ;;  %v880_v21 = vadd.f32 %v864_v44, %v828_v42  ;;  %v597_v49 = vld [vmem:[#allocation2 + $0xd0] sm:$0xff]  ;;  %v616_v2 = vmul.f32 %v2701_v18, %v596_v63 }
 0x1a4   :  { %v1092_v52 = vadd.f32 %v1091_v25, %v1090_v23  ;;  %v614_v14 = vmul.f32 %v2701_v18, %v594_v48  ;;  %v682_v62 = vld [vmem:[#allocation2 + $0xa2] sm:$0xff]  ;;  %v913_v55 = vmul.f32 %v2720_v43, %v3116_v30  ;;  %v617_v5 = vmul.f32 %v2701_v18, %v597_v49 }
 0x1a5   :  { %v3250_v4 = vld [vmem:[#allocation2 + $0xc2] sm:$0xff]  ;;  %v1050_v6 = vadd.f32 %v1049_v3, %v1048_v26  ;;  %v3255_v40 = vld [vmem:[#allocation2 + $0xd2] sm:$0xff]  ;;  %v702_v42 = vmul.f32 %v2747_v59, %v682_v62  ;;  %v755_v39 = vmul.f32 %v2705_v20, %v596_v63  ;;  %v668_v44 = vadd.f32 %v3168_v31, %v616_v2 }
 0x1a6   :  { %v1093_v23 = vrot.slane %v1092_v52, 1  ;;  %v666_v27 = vadd.f32 %v3168_v31, %v614_v14  ;;  %v704_v25 = vmul.f32 %v2747_v59, %v3250_v4  ;;  %v669_v30 = vadd.f32 %v3179_v34, %v617_v5 }
 0x1a7   :  { %v3263_v48 = vmul.f32 0.015625, %v1050_v6  ;;  %v705_v18 = vmul.f32 %v2747_v59, %v3255_v40  ;;  %v771_v26 = vadd.f32 %v755_v39, %v3204_v36  ;;  %v756_v60 = vmul.f32 %v2705_v20, %v597_v49  ;;  %v897_v39 = vld [vmem:[#allocation2 + $0x130] sm:$0xff] }
 0x1a8   :  { %v1094_v3 = vadd.f32 %v1093_v23, %v1092_v52  ;;  %v718_v62 = vadd.f32 %v702_v42, %v666_v27  ;;  %v720_v46 = vadd.f32 %v704_v25, %v668_v44  ;;  %v859_v6 = vmul.f32 %v2715_v38, %v3250_v4 }
 0x1a9   :  { %v1110_v31 = vmul.f32 %v3263_v48, %v3263_v48  ;;  %v721_v14 = vadd.f32 %v705_v18, %v669_v30  ;;  %v823_v2 = vadd.f32 %v807_v47, %v771_v26  ;;  %v881_v59 = vadd.f32 %v865_v12, %v829_v32 }
 0x1aa   :  { %v1108_v56 = vmul.f32 0.015625, %v1094_v3  ;;  %v770_v5 = vadd.f32 %v3196_v24, %v718_v62  ;;  %v772_v34 = vadd.f32 %v756_v60, %v720_v46  ;;  %v860_v52 = vmul.f32 %v2715_v38, %v3255_v40 }
 0x1ab   :  { %v773_v36 = vadd.f32 %v3208_v16, %v721_v14  ;;  %v875_v42 = vadd.f32 %v859_v6, %v823_v2  ;;  %v878_v20 = vadd.f32 %v862_v45, %v826_v58  ;;  %v910_v44 = vmul.f32 %v2720_v43, %v596_v63  ;;  %v894_v58 = vld [vmem:[#allocation2 + $0x100] sm:$0xff] }
 0x1ac   :  { %v1112_v23 = vsub.f32 %v1108_v56, %v1110_v31  ;;  %v822_v27 = vadd.f32 %v3214_v7, %v770_v5  ;;  %v824_v47 = vadd.f32 %v808_v33, %v772_v34  ;;  %v911_v30 = vmul.f32 %v2720_v43, %v597_v49  ;;  %v1001_v31 = vld [vmem:[#allocation2 + $0x132] sm:$0xff] }
 0x1ad   :  { %v825_v25 = vadd.f32 %v809_v28, %v773_v36  ;;  %v915_v60 = vmul.f32 %v2720_v43, %v3118_v10  ;;  %v916_v46 = vmul.f32 %v2720_v43, %v3189_v53  ;;  %v917_v56 = vmul.f32 %v2720_v43, %v897_v39 }
 0x1ae   :  { %v1114_v24 = vmax.f32 %v1112_v23, 0.0  ;;  %v874_v38 = vadd.f32 %v858_v1, %v822_v27  ;;  %v876_v16 = vadd.f32 %v860_v52, %v824_v47  ;;  %v927_v7 = vadd.f32 %v911_v30, %v875_v42  ;;  %v3342_v30 = vld [vmem:[#allocation3 + $0x8] sm:$0xff] }
 0x1af   :  { %v877_v32 = vadd.f32 %v861_v61, %v825_v25  ;;  %v931_v33 = vadd.f32 %v915_v60, %v879_v22  ;;  %v932_v45 = vadd.f32 %v916_v46, %v880_v21  ;;  %v933_v49 = vadd.f32 %v917_v56, %v881_v59  ;;  %v946_v21 = vld [vmem:[#allocation2 + $0x101] sm:$0xff] }
 0x1b0   :  { %v1116_v12 = vadd.f32 1e-05, %v1114_v24  ;;  %v926_v28 = vadd.f32 %v910_v44, %v874_v38  ;;  %v928_v63 = vadd.f32 %v912_v9, %v876_v16  ;;  %v914_v18 = vmul.f32 %v2720_v43, %v894_v58  ;;  %v3732_v38 = vld [vmem:[#allocation14_spill] sm:$0xff] }
 0x1b1   :  { %v962_v10 = vmul.f32 %v2690_v0, %v3145_v57  ;;  %v963_v53 = vmul.f32 %v2690_v0, %v3147_v11  ;;  %v929_v1 = vadd.f32 %v913_v55, %v877_v32  ;;  %v964_v61 = vmul.f32 %v2690_v0, %v3131_v50 }
 0x1b2   :  { %2267 = vrsqrt.f32 %v1116_v12  ;;  %v967_v22 = vmul.f32 %v2690_v0, %v3135_v37  ;;  %v968_v9 = vmul.f32 %v2690_v0, %v3211_v8  ;;  %v969_v43 = vmul.f32 %v2690_v0, %v2982_v35  ;;  %v3733_v12 = vld [vmem:[#allocation22_spill] sm:$0xff] }
 0x1b3   :  { %v978_v26 = vadd.f32 %v962_v10, %v926_v28  ;;  %v979_v57 = vadd.f32 %v963_v53, %v927_v7  ;;  %v930_v3 = vadd.f32 %v914_v18, %v878_v20  ;;  %v965_v11 = vmul.f32 %v2690_v0, %v3133_v51  ;;  %v3735_v18 = vld [vmem:[#allocation24_spill] sm:$0xff]  ;;  %v3736_v10 = vld [vmem:[#allocation27_spill] sm:$0xff] }
 0x1b4   :  { %v980_v55 = vadd.f32 %v964_v61, %v928_v63  ;;  %v983_v62 = vadd.f32 %v967_v22, %v931_v33  ;;  %v984_v50 = vadd.f32 %v968_v9, %v932_v45  ;;  %v985_v14 = vadd.f32 %v969_v43, %v933_v49  ;;  %v3734_v63 = vld [vmem:[#allocation23_spill] sm:$0xff]  ;;  %v3738_v22 = vld [vmem:[#allocation25_spill] sm:$0xff]  ;;  %v3739_v43 = vld [vmem:[#allocation26_spill] sm:$0xff] }
 0x1b5   :  { %v1014_v37 = vmul.f32 %v3717_v19, %v3250_v4  ;;  %v1015_v8 = vmul.f32 %v3717_v19, %v3255_v40  ;;  %v966_v2 = vmul.f32 %v2690_v0, %v946_v21  ;;  %v981_v35 = vadd.f32 %v965_v11, %v929_v1  ;;  %v3737_v1 = vld [vmem:[#allocation18_spill] sm:$0xff] }
 0x1b6   :  { %v1016_v6 = vmul.f32 %v3717_v19, %v3157_v41  ;;  %v1019_v51 = vmul.f32 %v3717_v19, %v3172_v29  ;;  %v1020_v5 = vmul.f32 %v3717_v19, %v3232_v17  ;;  %v1021_v34 = vmul.f32 %v3717_v19, %v1001_v31 }
 0x1b7   :  { %v3313_v59 = vadd.f32 %v1014_v37, %v978_v26  ;;  %v3315_v4 = vadd.f32 %v1015_v8, %v979_v57  ;;  %v982_v36 = vadd.f32 %v966_v2, %v930_v3  ;;  %v1017_v0 = vmul.f32 %v3717_v19, %v3159_v15 }
 0x1b8   :  { %v3319_v40 = vadd.f32 %v1016_v6, %v980_v55  ;;  %v3321_v52 = vadd.f32 %v1019_v51, %v983_v62  ;;  %v3323_v41 = vadd.f32 %v1020_v5, %v984_v50  ;;  %v3325_v29 = vadd.f32 %v1021_v34, %v985_v14 }
 0x1b9   :  { %v1051_v17 = vadd.f32 %v3315_v4, %v3313_v59  ;;  %v1074_v42 = vmul.f32 %v3313_v59, %v3313_v59  ;;  %v1018_v20 = vmul.f32 %v3717_v19, %v3226_v13  ;;  %v3333_v39 = vadd.f32 %v1017_v0, %v981_v35 }
 0x1ba   :  { %v1075_v15 = vmul.f32 %v3315_v4, %v3315_v4  ;;  %v1076_v44 = vmul.f32 %v3319_v40, %v3319_v40  ;;  %v1079_v32 = vmul.f32 %v3321_v52, %v3321_v52 }
 0x1bb   :  { %v1052_v23 = vadd.f32 %v1051_v17, %v3319_v40  ;;  %v3338_v47 = vadd.f32 %v1018_v20, %v982_v36  ;;  %v1077_v13 = vmul.f32 %v3333_v39, %v3333_v39 }
 0x1bc   :  { %v2268_v27 = vpop.eup %2267  ;;  %v1095_v25 = vadd.f32 %v1075_v15, %v1074_v42 }
 0x1bd   :  { %v1120_v60 = vmul.f32 %v3342_v30, %v2268_v27  ;;  %v1053_v19 = vadd.f32 %v1052_v23, %v3333_v39  ;;  %v1078_v56 = vmul.f32 %v3338_v47, %v3338_v47 }
 0x1be   :  { %v1096_v46 = vadd.f32 %v1095_v25, %v1076_v44  ;;  %v1080_v25 = vmul.f32 %v3323_v41, %v3323_v41 }
 0x1bf   :  { %v1122_v24 = vmul.f32 %v1120_v60, %v3263_v48  ;;  %v1135_v16 = vrot.slane %v1120_v60, %v3732_v38  ;;  %v1054_v58 = vadd.f32 %v1053_v19, %v3338_v47  ;;  %v1081_v60 = vmul.f32 %v3325_v29, %v3325_v29 }
 0x1c0   :  { %v1097_v7 = vadd.f32 %v1096_v46, %v1077_v13 }
 0x1c1   :  { %v1126_v33 = vrot.slane %v1122_v24, 7  ;;  %v1140_v45 = vmul.f32 %v1135_v16, %v3086_v54  ;;  %v1141_v28 = vmul.f32 %v1135_v16, %v3733_v12  ;;  %v1142_v49 = vmul.f32 %v1135_v16, %v3734_v63  ;;  %v3740_v54 = vld [vmem:[#allocation19_spill] sm:$0xff] }
 0x1c2   :  { %v1143_v48 = vmul.f32 %v1135_v16, %v3735_v18  ;;  %v1144_v53 = vmul.f32 %v1135_v16, %v3736_v10  ;;  %v1145_v61 = vmul.f32 %v1135_v16, %v3737_v1  ;;  %v1146_v21 = vmul.f32 %v1135_v16, %v3738_v22 }
 0x1c3   :  { %v1130_v9 = vsub.f32 %v3342_v30, %v1126_v33  ;;  %v1147_v26 = vmul.f32 %v1135_v16, %v3739_v43  ;;  %v1055_v57 = vadd.f32 %v1054_v58, %v3321_v52  ;;  %v1098_v3 = vadd.f32 %v1097_v7, %v1078_v56 }
 0x1c5   :  { %v1159_v11 = vrot.slane %v1130_v9, %v3740_v54  ;;  %v1056_v55 = vadd.f32 %v1055_v57, %v3323_v41  ;;  %v1099_v62 = vadd.f32 %v1098_v3, %v1079_v32 }
 0x1c7   :  { %v1164_v31 = vadd.f32 %v1159_v11, %v1140_v45  ;;  %v3367_v50 = vadd.f32 %v1159_v11, %v1141_v28  ;;  %v3369_v14 = vadd.f32 %v1159_v11, %v1142_v49  ;;  %v3371_v37 = vadd.f32 %v1159_v11, %v1143_v48 }
 0x1c8   :  { %v3373_v8 = vadd.f32 %v1159_v11, %v1144_v53  ;;  %v3375_v2 = vadd.f32 %v1159_v11, %v1145_v61  ;;  %v3377_v35 = vadd.f32 %v1159_v11, %v1146_v21  ;;  %v3379_v6 = vadd.f32 %v1159_v11, %v1147_v26 }
 0x1c9   :  { %v1196_v51 = vmul.f32 0.035677407, %v1164_v31  ;;  %v1197_v5 = vmul.f32 0.035677407, %v3367_v50  ;;  %v1198_v34 = vmul.f32 0.035677407, %v3369_v14  ;;  %v1057_v49 = vadd.f32 %v1056_v55, %v3325_v29 }
 0x1ca   :  { %v1199_v36 = vmul.f32 0.035677407, %v3371_v37  ;;  %v1200_v15 = vmul.f32 0.035677407, %v3373_v8  ;;  %v1201_v23 = vmul.f32 0.035677407, %v3375_v2  ;;  %v1100_v10 = vadd.f32 %v1099_v62, %v1080_v25 }
 0x1cb   :  { %v1212_v0 = vmul.f32 %v1196_v51, %v1164_v31  ;;  %v1213_v17 = vmul.f32 %v1197_v5, %v3367_v50  ;;  %v1214_v42 = vmul.f32 %v1198_v34, %v3369_v14  ;;  %v1202_v56 = vmul.f32 0.035677407, %v3377_v35 }
 0x1cc   :  { %v1215_v20 = vmul.f32 %v1199_v36, %v3371_v37  ;;  %v1216_v46 = vmul.f32 %v1200_v15, %v3373_v8  ;;  %v1217_v24 = vmul.f32 %v1201_v23, %v3375_v2  ;;  %v1203_v32 = vmul.f32 0.035677407, %v3379_v6 }
 0x1cd   :  { %v1228_v27 = vadd.f32 0.7978846, %v1212_v0  ;;  %v1229_v44 = vadd.f32 0.7978846, %v1213_v17  ;;  %v1230_v19 = vadd.f32 0.7978846, %v1214_v42  ;;  %v1218_v28 = vmul.f32 %v1202_v56, %v3377_v35 }
 0x1ce   :  { %v1231_v13 = vadd.f32 0.7978846, %v1215_v20  ;;  %v1232_v45 = vadd.f32 0.7978846, %v1216_v46  ;;  %v1233_v12 = vadd.f32 0.7978846, %v1217_v24  ;;  %v1219_v63 = vmul.f32 %v1203_v32, %v3379_v6 }
 0x1cf   :  { %v1244_v16 = vmul.f32 %v1228_v27, %v1164_v31  ;;  %v1245_v58 = vmul.f32 %v1229_v44, %v3367_v50  ;;  %v1246_v7 = vmul.f32 %v1230_v19, %v3369_v14  ;;  %v1234_v53 = vadd.f32 0.7978846, %v1218_v28 }
 0x1d0   :  { %v1247_v33 = vmul.f32 %v1231_v13, %v3371_v37  ;;  %v1248_v18 = vmul.f32 %v1232_v45, %v3373_v8  ;;  %v1249_v48 = vmul.f32 %v1233_v12, %v3375_v2  ;;  %v1235_v1 = vadd.f32 0.7978846, %v1219_v63 }
 0x1d1   :  { %2269 = vtanh.f32 %v1244_v16  ;;  %v1058_v61 = vrot.slane %v1057_v49, 4  ;;  %v1101_v22 = vadd.f32 %v1100_v10, %v1081_v60  ;;  %v1250_v21 = vmul.f32 %v1234_v53, %v3377_v35 }
 0x1d2   :  { %2271 = vtanh.f32 %v1245_v58  ;;  %v1251_v9 = vmul.f32 %v1235_v1, %v3379_v6  ;;  %v1180_v34 = vmul.f32 0.5, %v1164_v31  ;;  %v1181_v42 = vmul.f32 0.5, %v3367_v50 }
 0x1d3   :  { %2273 = vtanh.f32 %v1246_v7  ;;  %v1059_v43 = vadd.f32 %v1058_v61, %v1057_v49  ;;  %v1102_v26 = vrot.slane %v1101_v22, 4  ;;  %v1182_v15 = vmul.f32 0.5, %v3369_v14 }
 0x1d4   :  { %2275 = vtanh.f32 %v1247_v33  ;;  %v1183_v25 = vmul.f32 0.5, %v3371_v37  ;;  %v1184_v31 = vmul.f32 0.5, %v3373_v8  ;;  %v1185_v50 = vmul.f32 0.5, %v3375_v2 }
 0x1d5   :  { %2277 = vtanh.f32 %v1248_v18  ;;  %v1060_v57 = vrot.slane %v1059_v43, 2  ;;  %v1103_v3 = vadd.f32 %v1102_v26, %v1101_v22  ;;  %v1186_v49 = vmul.f32 0.5, %v3377_v35 }
 0x1d6   :  { %2279 = vtanh.f32 %v1249_v48  ;;  %v1187_v53 = vmul.f32 0.5, %v3379_v6 }
 0x1d7   :  { %2281 = vtanh.f32 %v1250_v21  ;;  %v1061_v11 = vadd.f32 %v1060_v57, %v1059_v43  ;;  %v1104_v55 = vrot.slane %v1103_v3, 2 }
 0x1d8   :  { %2283 = vtanh.f32 %v1251_v9 }
 0x1d9   :  { %v1062_v51 = vrot.slane %v1061_v11, 1  ;;  %v1105_v0 = vadd.f32 %v1104_v55, %v1103_v3 }
 0x1db   :  { %v2270_v62 = vpop.eup %2269  ;;  %v1063_v23 = vadd.f32 %v1062_v51, %v1061_v11  ;;  %v1106_v19 = vrot.slane %v1105_v0, 1 }
 0x1dc   :  { %v2272_v5 = vpop.eup %2271  ;;  %v1276_v36 = vadd.f32 1.0, %v2270_v62 }
 0x1dd   :  { %v2274_v17 = vpop.eup %2273  ;;  %v1277_v20 = vadd.f32 1.0, %v2272_v5  ;;  %v1065_v16 = vmul.f32 0.015625, %v1063_v23  ;;  %v1107_v7 = vadd.f32 %v1106_v19, %v1105_v0 }
 0x1de   :  { %v2276_v27 = vpop.eup %2275  ;;  %v1292_v44 = vmul.f32 %v1276_v36, %v1180_v34  ;;  %v1278_v60 = vadd.f32 1.0, %v2274_v17 }
 0x1df   :  { %v2278_v13 = vpop.eup %2277  ;;  %v1293_v46 = vmul.f32 %v1277_v20, %v1181_v42  ;;  %v1279_v24 = vadd.f32 1.0, %v2276_v27  ;;  %v1111_v28 = vmul.f32 %v1065_v16, %v1065_v16  ;;  %v1109_v48 = vmul.f32 0.015625, %v1107_v7 }
 0x1e0   :  { %v2280_v58 = vpop.eup %2279  ;;  %v1294_v56 = vmul.f32 %v1278_v60, %v1182_v15  ;;  %v1280_v32 = vadd.f32 1.0, %v2278_v13 }
 0x1e1   :  { %v2282_v14 = vpop.eup %2281  ;;  %v1308_v33 = vpack.c.bf16 %v1293_v46, %v1292_v44  ;;  %v1295_v45 = vmul.f32 %v1279_v24, %v1183_v25  ;;  %v1281_v12 = vadd.f32 1.0, %v2280_v58  ;;  %v1113_v61 = vsub.f32 %v1109_v48, %v1111_v28 }
 0x1e2   :  { %v2284_v37 = vpop.eup %2283  ;;  %v1296_v63 = vmul.f32 %v1280_v32, %v1184_v31  ;;  %v1282_v18 = vadd.f32 1.0, %v2282_v14 }
 0x1e3   :  { %2140 = vmatprep.mubr.bf16.mxu1 %v1308_v33  ;;  %v1309_v8 = vpack.c.bf16 %v1295_v45, %v1294_v56  ;;  %v1297_v10 = vmul.f32 %v1281_v12, %v1185_v50  ;;  %v1283_v1 = vadd.f32 1.0, %v2284_v37  ;;  %v1115_v9 = vmax.f32 %v1113_v61, 0.0 }
 0x1e4   :  { %v1298_v2 = vmul.f32 %v1282_v18, %v1186_v49 }
 0x1e5   :  { %2141 = vmatmul.mubr.bf16.vlgmr.msra.gmra.mrb[0].mxu1 %v1309_v8  ;;  %v1310_v22 = vpack.c.bf16 %v1297_v10, %v1296_v63  ;;  %v1299_v21 = vmul.f32 %v1283_v1, %v1187_v53  ;;  %v1117_v26 = vadd.f32 1e-05, %v1115_v9 }
 0x1e7   :  { %2144 = vmatprep.mubr.bf16.mxu1 %v1310_v22  ;;  %v1311_v43 = vpack.c.bf16 %v1299_v21, %v1298_v2  ;;  %2285 = vrsqrt.f32 %v1117_v26 }
 0x1ed   :  { %2145 = vmatmul.mubr.bf16.gmra.mrb[4].mxu1 %v1311_v43 }
 0x1f1   :  { %v2286_v35 = vpop.eup %2285 }
 0x1f2   :  { %v1121_v57 = vmul.f32 %v3342_v30, %v2286_v35 }
 0x1f4   :  { %v1123_v3 = vmul.f32 %v1121_v57, %v1065_v16  ;;  %v1139_v11 = vrot.slane %v1121_v57, %v3732_v38 }
 0x1f6   :  { %v1127_v55 = vrot.slane %v1123_v3, 7  ;;  %v1148_v6 = vmul.f32 %v1139_v11, %v3313_v59  ;;  %v1149_v62 = vmul.f32 %v1139_v11, %v3315_v4  ;;  %v1150_v51 = vmul.f32 %v1139_v11, %v3319_v40 }
 0x1f7   :  { %v1151_v5 = vmul.f32 %v1139_v11, %v3333_v39  ;;  %v1153_v34 = vmul.f32 %v1139_v11, %v3321_v52  ;;  %v1154_v36 = vmul.f32 %v1139_v11, %v3323_v41  ;;  %v1155_v17 = vmul.f32 %v1139_v11, %v3325_v29 }
 0x1f8   :  { %v1131_v0 = vsub.f32 %v3342_v30, %v1127_v55  ;;  %v1152_v38 = vmul.f32 %v1139_v11, %v3338_v47 }
 0x1fa   :  { %v1163_v42 = vrot.slane %v1131_v0, %v3740_v54 }
 0x1fc   :  { %v1172_v20 = vadd.f32 %v1163_v42, %v1148_v6  ;;  %v1173_v59 = vadd.f32 %v1163_v42, %v1149_v62  ;;  %v1174_v15 = vadd.f32 %v1163_v42, %v1150_v51  ;;  %v1175_v4 = vadd.f32 %v1163_v42, %v1151_v5 }
 0x1fd   :  { %v1176_v23 = vadd.f32 %v1163_v42, %v1152_v38  ;;  %v3426_v40 = vadd.f32 %v1163_v42, %v1153_v34  ;;  %v3428_v39 = vadd.f32 %v1163_v42, %v1154_v36  ;;  %v3430_v52 = vadd.f32 %v1163_v42, %v1155_v17 }
 0x1fe   :  { %v1204_v41 = vmul.f32 0.035677407, %v1172_v20  ;;  %v1205_v27 = vmul.f32 0.035677407, %v1173_v59  ;;  %v1206_v44 = vmul.f32 0.035677407, %v1174_v15 }
 0x1ff   :  { %v1207_v25 = vmul.f32 0.035677407, %v1175_v4  ;;  %v1208_v47 = vmul.f32 0.035677407, %v1176_v23  ;;  %v1209_v13 = vmul.f32 0.035677407, %v3426_v40 }
 0x200   :  { %v1220_v29 = vmul.f32 %v1204_v41, %v1172_v20  ;;  %v1221_v60 = vmul.f32 %v1205_v27, %v1173_v59  ;;  %v1222_v54 = vmul.f32 %v1206_v44, %v1174_v15  ;;  %v1210_v7 = vmul.f32 0.035677407, %v3428_v39 }
 0x201   :  { %v1223_v19 = vmul.f32 %v1207_v25, %v1175_v4  ;;  %v1224_v58 = vmul.f32 %v1208_v47, %v1176_v23  ;;  %v1225_v56 = vmul.f32 %v1209_v13, %v3426_v40  ;;  %v1211_v14 = vmul.f32 0.035677407, %v3430_v52 }
 0x202   :  { %v1236_v46 = vadd.f32 0.7978846, %v1220_v29  ;;  %v1237_v24 = vadd.f32 0.7978846, %v1221_v60  ;;  %v1238_v31 = vadd.f32 0.7978846, %v1222_v54  ;;  %v1226_v37 = vmul.f32 %v1210_v7, %v3428_v39 }
 0x203   :  { %v1239_v16 = vadd.f32 0.7978846, %v1223_v19  ;;  %v1240_v12 = vadd.f32 0.7978846, %v1224_v58  ;;  %v1241_v28 = vadd.f32 0.7978846, %v1225_v56  ;;  %v1227_v63 = vmul.f32 %v1211_v14, %v3430_v52 }
 0x204   :  { %v1252_v50 = vmul.f32 %v1236_v46, %v1172_v20  ;;  %v1253_v32 = vmul.f32 %v1237_v24, %v1173_v59  ;;  %v1254_v33 = vmul.f32 %v1238_v31, %v1174_v15  ;;  %v1242_v48 = vadd.f32 0.7978846, %v1226_v37  ;;  %v2215_v56 = vld [vmem:[%s3663_s4] sm:$0xff]  }
 0x205   :  { %v1255_v45 = vmul.f32 %v1239_v16, %v1175_v4  ;;  %v1256_v49 = vmul.f32 %v1240_v12, %v1176_v23  ;;  %v1257_v18 = vmul.f32 %v1241_v28, %v3426_v40  ;;  %v1243_v8 = vadd.f32 0.7978846, %v1227_v63 }
 0x206   :  { %2287 = vtanh.f32 %v1252_v50  ;;  %v1258_v10 = vmul.f32 %v1242_v48, %v3428_v39  ;;  %v1188_v61 = vmul.f32 0.5, %v1172_v20  ;;  %v1189_v9 = vmul.f32 0.5, %v1173_v59 }
 0x207   :  { %2289 = vtanh.f32 %v1253_v32  ;;  %v1259_v53 = vmul.f32 %v1243_v8, %v3430_v52  ;;  %v1190_v57 = vmul.f32 0.5, %v1174_v15  ;;  %v1191_v6 = vmul.f32 0.5, %v1175_v4 }
 0x208   :  { %2291 = vtanh.f32 %v1254_v33  ;;  %v1192_v34 = vmul.f32 0.5, %v1176_v23  ;;  %v1193_v38 = vmul.f32 0.5, %v3426_v40  ;;  %v1194_v27 = vmul.f32 0.5, %v3428_v39 }
 0x209   :  { %2293 = vtanh.f32 %v1255_v45  ;;  %v1195_v4 = vmul.f32 0.5, %v3430_v52  ;;  %v2392_v50 = vmov 0.0  }
 0x20a   :  { %2295 = vtanh.f32 %v1256_v49  ;;  %2156 = vmatprep.subr.bf16.mxu0 %v2392_v50  ;;  %2176 = vmatprep.subr.bf16.mxu1 %v2392_v50  ;;  %v2216_v49 = vld [vmem:[%s3663_s4 + $0x8] sm:$0xff]  }
 0x20b   :  { %2297 = vtanh.f32 %v1257_v18  ;;  %2157 = vmatpush3.bf16.msra.mxu0 %v2215_v56  ;;  %2172 = vmatprep.mubr.msk.bf16.mxu0 %vm2393_vm2, %v2392_v50 }
 0x20c   :  { %2299 = vtanh.f32 %v1258_v10  ;;  %2158 = vmatprep.subr.bf16.mxu0 %v2392_v50 }
 0x20d   :  { %2301 = vtanh.f32 %v1259_v53 }
 0x20f   :  { %2159 = vmatpush3.bf16.msra.mxu0 %v2216_v49 }
 0x210   :  { %v2288_v1 = vpop.eup %2287  ;;  %2160 = vmatprep.subr.bf16.mxu0 %v2392_v50 }
 0x211   :  { %v2290_v2 = vpop.eup %2289  ;;  %v1284_v22 = vadd.f32 1.0, %v2288_v1 }
 0x212   :  { %v2292_v21 = vpop.eup %2291  ;;  %v1285_v43 = vadd.f32 1.0, %v2290_v2 }
 0x213   :  { %v2294_v26 = vpop.eup %2293  ;;  %v1300_v35 = vmul.f32 %v1284_v22, %v1188_v61  ;;  %v1286_v3 = vadd.f32 1.0, %v2292_v21  ;;  %v2217_v61 = vld [vmem:[%s3663_s4 + $0x10] sm:$0xff]  }
 0x214   :  { %v2296_v11 = vpop.eup %2295  ;;  %v1301_v55 = vmul.f32 %v1285_v43, %v1189_v9  ;;  %v1287_v62 = vadd.f32 1.0, %v2294_v26  ;;  %2161 = vmatpush3.bf16.msra.mxu0 %v2217_v61  ;;  %v2218_v43 = vld [vmem:[%s3663_s4 + $0x18] sm:$0xff]  }
 0x215   :  { %v2298_v51 = vpop.eup %2297  ;;  %v1302_v5 = vmul.f32 %v1286_v3, %v1190_v57  ;;  %v1288_v36 = vadd.f32 1.0, %v2296_v11  ;;  %2162 = vmatprep.subr.bf16.mxu0 %v2392_v50  ;;  %v2219_v11 = vld [vmem:[%s3663_s4 + $0x20] sm:$0xff]  }
 0x216   :  { %v2300_v0 = vpop.eup %2299  ;;  %v1312_v17 = vpack.c.bf16 %v1301_v55, %v1300_v35  ;;  %v1303_v42 = vmul.f32 %v1287_v62, %v1191_v6  ;;  %v1289_v20 = vadd.f32 1.0, %v2298_v51 }
 0x217   :  { %v2302_v59 = vpop.eup %2301  ;;  %v1304_v41 = vmul.f32 %v1288_v36, %v1192_v34  ;;  %v1290_v15 = vadd.f32 1.0, %v2300_v0  ;;  %v2223_v0 = vld [vmem:[#allocation6] sm:$0xff]  }
 0x218   :  { %2148 = vmatprep.mubr.bf16.mxu1 %v1312_v17  ;;  %v1313_v44 = vpack.c.bf16 %v1303_v42, %v1302_v5  ;;  %v1305_v25 = vmul.f32 %v1289_v20, %v1193_v38  ;;  %v1291_v29 = vadd.f32 1.0, %v2302_v59  ;;  %2163 = vmatpush3.bf16.msra.mxu0 %v2218_v43  ;;  %v2220_v5 = vld [vmem:[%s3663_s4 + $0x28] sm:$0xff]   ;;  %v2221_v38 = vld [vmem:[%s3663_s4 + $0x30] sm:$0xff]  }
 0x219   :  { %v1306_v60 = vmul.f32 %v1290_v15, %v1194_v27  ;;  %2164 = vmatprep.subr.bf16.mxu0 %v2392_v50  ;;  %2177 = vmatpush3.bf16.msra.mxu1 %v2223_v0  ;;  %v2222_v15 = vld [vmem:[%s3663_s4 + $0x38] sm:$0xff]   ;;  %s2395_s4 = smov [#allocation8]  }
 0x21a   :  { %2149 = vmatmul.mubr.bf16.gmra.mrb[8].mxu1 %v1313_v44  ;;  %v1314_v23 = vpack.c.bf16 %v1305_v25, %v1304_v41  ;;  %v1307_v54 = vmul.f32 %v1291_v29, %v1195_v4  ;;  %2178 = vmatprep.subr.bf16.mxu1 %v2392_v50  ;;  %s2016_s13 = sshll.u32 %s2395_s4, 4  ;;  %s2017_s13 = int_to_ptr.vmem [resolvable:$true] %s2016_s13 }
 0x21b   :  { %s2358_s14 = scalar_lea.vmem %s2017_s13, 1024  ;;  %p2363_p3 = scmp.lt.s32.totalorder %s2017_s13, %s2017_s13 }
 0x21c   :  { %2152 = vmatprep.mubr.bf16.mxu1 %v1314_v23  ;;  %v1315_v19 = vpack.c.bf16 %v1307_v54, %v1306_v60  ;;  %2165 = vmatpush3.bf16.msra.mxu0 %v2219_v11  ;;  %v3741_v54 = vld [vmem:[#allocation16_spill] sm:$0xff]  ;;  %p2359_p2 = scmp.ne.s32.totalorder %s2017_s13, %s2358_s14  ;;  %p2364_p4 = scmp.lt.s32.totalorder %s2358_s14, %s2358_s14 }
 0x21d   :  { %2166 = vmatprep.subr.bf16.mxu0 %v2392_v50 }
 0x21e   :  { %p2365_p5 = por %p2364_p4, %p2363_p3 }
 0x220   :  { %2167 = vmatpush3.bf16.msra.mxu0 %v2220_v5  ;;  %p2366_p6 = pnand %p2365_p5, %p2359_p2 }
 0x221   :  { %2168 = vmatprep.subr.bf16.mxu0 %v2392_v50 }
 0x222   :  { %2153 = vmatmul.mubr.bf16.gmra.mrb[12].mxu1 %v1315_v19 }
 0x223   :  { %2192 = vmatprep.mubr.msk.bf16.mxu1 %vm2393_vm2, %v2392_v50 }
 0x224   :  { %2169 = vmatpush3.bf16.msra.mxu0 %v2221_v38 }
 0x225   :  { %2170 = vmatprep.subr.bf16.mxu0 %v2392_v50 }
 0x228   :  { %2171 = vmatpush3.bf16.msra.mxu0 %v2222_v15 }
 0x2b8   :  { %v3444_v40 = vpop.f32.mrb[0].mxu1 }
 0x2b9   :  { %v3446_v47 = vpop.f32.mrb[1].mxu1  ;;  %v1507_v31 = vmul.f32 %v3444_v40, %v3444_v40 }
 0x2ba   :  { %v3448_v13 = vpop.f32.mrb[2].mxu1  ;;  %v1505_v46 = vmul.f32 %v3446_v47, %v3446_v47 }
 0x2bb   :  { %v3450_v39 = vpop.f32.mrb[3].mxu1  ;;  %v1508_v32 = vmul.f32 %v3448_v13, %v3448_v13 }
 0x2bc   :  { %v1477_v52 = vadd.f32 %v3450_v39, %v3446_v47  ;;  %v1506_v24 = vmul.f32 %v3450_v39, %v3450_v39 }
 0x2be   :  { %v1478_v16 = vadd.f32 %v3444_v40, %v1477_v52  ;;  %v1521_v58 = vadd.f32 %v1506_v24, %v1505_v46 }
 0x2c0   :  { %v1522_v7 = vadd.f32 %v1521_v58, %v1507_v31  ;;  %v3468_v14 = vpop.f32.mrb[4].mxu1  ;;  %v1479_v33 = vadd.f32 %v3448_v13, %v1478_v16 }
 0x2c1   :  { %v3471_v45 = vpop.f32.mrb[5].mxu1  ;;  %v1511_v53 = vmul.f32 %v3468_v14, %v3468_v14 }
 0x2c2   :  { %v1480_v12 = vadd.f32 %v1479_v33, %v3471_v45  ;;  %v1509_v28 = vmul.f32 %v3471_v45, %v3471_v45  ;;  %v1523_v37 = vadd.f32 %v1522_v7, %v1508_v32  ;;  %v3477_v63 = vpop.f32.mrb[6].mxu1 }
 0x2c3   :  { %v3482_v18 = vpop.f32.mrb[7].mxu1  ;;  %v1512_v22 = vmul.f32 %v3477_v63, %v3477_v63 }
 0x2c4   :  { %v1524_v48 = vadd.f32 %v1523_v37, %v1509_v28  ;;  %v1481_v8 = vadd.f32 %v1480_v12, %v3482_v18  ;;  %v1510_v10 = vmul.f32 %v3482_v18, %v3482_v18 }
 0x2c6   :  { %v1482_v1 = vadd.f32 %v3468_v14, %v1481_v8  ;;  %v1525_v2 = vadd.f32 %v1524_v48, %v1510_v10 }
 0x2c8   :  { %v1483_v21 = vadd.f32 %v3477_v63, %v1482_v1  ;;  %v1526_v9 = vadd.f32 %v1525_v2, %v1511_v53 }
 0x2ca   :  { %v1484_v26 = vrot.slane %v1483_v21, 4  ;;  %v1527_v35 = vadd.f32 %v1526_v9, %v1512_v22 }
 0x2cc   :  { %v1485_v57 = vadd.f32 %v1484_v26, %v1483_v21  ;;  %v1528_v3 = vrot.slane %v1527_v35, 4 }
 0x2ce   :  { %v1486_v55 = vrot.slane %v1485_v57, 2  ;;  %v1529_v6 = vadd.f32 %v1528_v3, %v1527_v35 }
 0x2d0   :  { %v1487_v62 = vadd.f32 %v1486_v55, %v1485_v57  ;;  %v1530_v51 = vrot.slane %v1529_v6, 2 }
 0x2d2   :  { %v1488_v34 = vrot.slane %v1487_v62, 1  ;;  %v1531_v36 = vadd.f32 %v1530_v51, %v1529_v6 }
 0x2d4   :  { %v1489_v17 = vadd.f32 %v1488_v34, %v1487_v62  ;;  %v1532_v42 = vrot.slane %v1531_v36, 1 }
 0x2d6   :  { %v1503_v20 = vmul.f32 0.015625, %v1489_v17  ;;  %v1533_v59 = vadd.f32 %v1532_v42, %v1531_v36 }
 0x2d8   :  { %v1547_v41 = vmul.f32 0.015625, %v1533_v59  ;;  %v1549_v27 = vmul.f32 %v1503_v20, %v1503_v20 }
 0x2da   :  { %v1551_v44 = vsub.f32 %v1547_v41, %v1549_v27 }
 0x2dc   :  { %v1553_v25 = vmax.f32 %v1551_v44, 0.0 }
 0x2de   :  { %v1555_v4 = vadd.f32 1e-05, %v1553_v25 }
 0x2e0   :  { %2303 = vrsqrt.f32 %v1555_v4 }
 0x2ea   :  { %v2304_v29 = vpop.eup %2303 }
 0x2eb   :  { %v1559_v60 = vmul.f32 %v3342_v30, %v2304_v29 }
 0x2ed   :  { %v1561_v23 = vmul.f32 %v1559_v60, %v1503_v20  ;;  %v1574_v19 = vrot.slane %v1559_v60, %v3741_v54  ;;  %v3529_v7 = vpop.f32.mrb[8].mxu1 }
 0x2ee   :  { %v3533_v28 = vpop.f32.mrb[9].mxu1  ;;  %v1515_v2 = vmul.f32 %v3529_v7, %v3529_v7 }
 0x2ef   :  { %v1565_v46 = vrot.slane %v1561_v23, 7  ;;  %v1579_v52 = vmul.f32 %v1574_v19, %v3446_v47  ;;  %v1580_v24 = vmul.f32 %v1574_v19, %v3450_v39  ;;  %v1581_v31 = vmul.f32 %v3444_v40, %v1574_v19  ;;  %v3535_v47 = vpop.f32.mrb[10].mxu1  ;;  %v3742_v39 = vld [vmem:[#allocation15_spill] sm:$0xff] }
 0x2f0   :  { %v1582_v16 = vmul.f32 %v3448_v13, %v1574_v19  ;;  %v1583_v58 = vmul.f32 %v1574_v19, %v3471_v45  ;;  %v1584_v56 = vmul.f32 %v1574_v19, %v3482_v18  ;;  %v1585_v32 = vmul.f32 %v3468_v14, %v1574_v19  ;;  %v3538_v37 = vpop.f32.mrb[11].mxu1 }
 0x2f1   :  { %v1569_v33 = vsub.f32 %v3342_v30, %v1565_v46  ;;  %v1586_v12 = vmul.f32 %v3477_v63, %v1574_v19  ;;  %v1513_v13 = vmul.f32 %v3533_v28, %v3533_v28  ;;  %v1490_v14 = vadd.f32 %v3538_v37, %v3533_v28 }
 0x2f2   :  { %v1514_v45 = vmul.f32 %v3538_v37, %v3538_v37  ;;  %v1516_v9 = vmul.f32 %v3535_v47, %v3535_v47 }
 0x2f3   :  { %v1598_v40 = vrot.slane %v1569_v33, %v3742_v39  ;;  %v1491_v61 = vadd.f32 %v3529_v7, %v1490_v14 }
 0x2f4   :  { %v1534_v22 = vadd.f32 %v1514_v45, %v1513_v13 }
 0x2f5   :  { %v3546_v49 = vadd.f32 %v1598_v40, %v1579_v52  ;;  %v3548_v63 = vadd.f32 %v1598_v40, %v1580_v24  ;;  %v3550_v18 = vadd.f32 %v1598_v40, %v1581_v31  ;;  %v3552_v48 = vadd.f32 %v1598_v40, %v1582_v16  ;;  %v2154_v21 = vpop.f32.mrb[12].mxu1 }
 0x2f6   :  { %v3554_v8 = vadd.f32 %v1598_v40, %v1583_v58  ;;  %v3556_v10 = vadd.f32 %v1598_v40, %v1584_v56  ;;  %v3558_v53 = vadd.f32 %v1598_v40, %v1585_v32  ;;  %v3560_v1 = vadd.f32 %v1598_v40, %v1586_v12  ;;  %v1462_v26 = vpop.f32.mrb[13].mxu1 }
 0x2f7   :  { %v1535_v43 = vadd.f32 %v1534_v22, %v1515_v2  ;;  %v1492_v35 = vadd.f32 %v3535_v47, %v1491_v61  ;;  %v1517_v57 = vmul.f32 %v1462_v26, %v1462_v26  ;;  %v2155_v3 = vpop.f32.mrb[14].mxu1  ;;  %v1519_v34 = vmul.f32 %v2154_v21, %v2154_v21 }
 0x2f8   :  { %v1465_v6 = vpop.f32.mrb[15].mxu1  ;;  %v1520_v17 = vmul.f32 %v2155_v3, %v2155_v3  ;;  %v1619_v46 = vadd.f32 %v3548_v63, %v3546_v49 }
 0x2f9   :  { %v1493_v11 = vadd.f32 %v1492_v35, %v1462_v26  ;;  %v1536_v55 = vadd.f32 %v1535_v43, %v1516_v9  ;;  %v1518_v62 = vmul.f32 %v1465_v6, %v1465_v6 }
 0x2fa   :  { %v1620_v58 = vadd.f32 %v1619_v46, %v3550_v18 }
 0x2fb   :  { %v1537_v51 = vadd.f32 %v1536_v55, %v1517_v57  ;;  %v1494_v5 = vadd.f32 %v1493_v11, %v1465_v6 }
 0x2fc   :  { %v1621_v33 = vadd.f32 %v1620_v58, %v3552_v48 }
 0x2fd   :  { %v1495_v36 = vadd.f32 %v2154_v21, %v1494_v5  ;;  %v1538_v0 = vadd.f32 %v1537_v51, %v1518_v62 }
 0x2fe   :  { %v1622_v40 = vadd.f32 %v1621_v33, %v3554_v8 }
 0x2ff   :  { %v1496_v42 = vadd.f32 %v2155_v3, %v1495_v36  ;;  %v1539_v38 = vadd.f32 %v1538_v0, %v1519_v34 }
 0x300   :  { %v1623_v13 = vadd.f32 %v1622_v40, %v3556_v10  ;;  %v2224_v40 = vld [vmem:[#allocation6 + $0x8] sm:$0xff]  }
 0x301   :  { %v1497_v20 = vrot.slane %v1496_v42, 4  ;;  %v1540_v59 = vadd.f32 %v1539_v38, %v1520_v17  ;;  %2179 = vmatpush3.bf16.msra.mxu1 %v2224_v40 }
 0x302   :  { %v1624_v45 = vadd.f32 %v1623_v13, %v3558_v53  ;;  %2180 = vmatprep.subr.bf16.mxu1 %v2392_v50  ;;  %v2225_v13 = vld [vmem:[#allocation6 + $0x10] sm:$0xff]  }
 0x303   :  { %v1498_v41 = vadd.f32 %v1497_v20, %v1496_v42  ;;  %v1541_v27 = vrot.slane %v1540_v59, 4 }
 0x304   :  { %v1625_v9 = vadd.f32 %v1624_v45, %v3560_v1  ;;  %v2227_v45 = vld [vmem:[#allocation6 + $0x20] sm:$0xff]  }
 0x305   :  { %v1499_v15 = vrot.slane %v1498_v41, 2  ;;  %v1542_v44 = vadd.f32 %v1541_v27, %v1540_v59  ;;  %2181 = vmatpush3.bf16.msra.mxu1 %v2225_v13 }
 0x306   :  { %2182 = vmatprep.subr.bf16.mxu1 %v2392_v50 }
 0x307   :  { %v1500_v25 = vadd.f32 %v1499_v15, %v1498_v41  ;;  %v1543_v4 = vrot.slane %v1542_v44, 2 }
 0x309   :  { %v1501_v29 = vrot.slane %v1500_v25, 1  ;;  %v1544_v60 = vadd.f32 %v1543_v4, %v1542_v44 }
 0x30b   :  { %v1502_v23 = vadd.f32 %v1501_v29, %v1500_v25  ;;  %v1545_v19 = vrot.slane %v1544_v60, 1 }
 0x30d   :  { %v1504_v52 = vmul.f32 0.015625, %v1502_v23  ;;  %v1546_v24 = vadd.f32 %v1545_v19, %v1544_v60 }
 0x30f   :  { %v1548_v31 = vmul.f32 0.015625, %v1546_v24  ;;  %v1550_v16 = vmul.f32 %v1504_v52, %v1504_v52 }
 0x311   :  { %v1552_v56 = vsub.f32 %v1548_v31, %v1550_v16 }
 0x313   :  { %v1554_v32 = vmax.f32 %v1552_v56, 0.0 }
 0x315   :  { %v1556_v12 = vadd.f32 1e-05, %v1554_v32 }
 0x317   :  { %2305 = vrsqrt.f32 %v1556_v12 }
 0x321   :  { %v2306_v14 = vpop.eup %2305 }
 0x322   :  { %v1560_v2 = vmul.f32 %v3342_v30, %v2306_v14  ;;  %v2226_v14 = vld [vmem:[#allocation6 + $0x18] sm:$0xff]  }
 0x323   :  { %2183 = vmatpush3.bf16.msra.mxu1 %v2226_v14 }
 0x324   :  { %v1562_v61 = vmul.f32 %v1560_v2, %v1504_v52  ;;  %v1578_v22 = vrot.slane %v1560_v2, %v3741_v54  ;;  %v1626_v54 = vrot.slane %v1625_v9, 4  ;;  %2184 = vmatprep.subr.bf16.mxu1 %v2392_v50  ;;  %v2228_v2 = vld [vmem:[#allocation6 + $0x28] sm:$0xff]  }
 0x326   :  { %v1566_v43 = vrot.slane %v1562_v61, 7  ;;  %v1587_v35 = vmul.f32 %v1578_v22, %v3533_v28  ;;  %v1588_v57 = vmul.f32 %v1578_v22, %v3538_v37  ;;  %v1589_v11 = vmul.f32 %v3529_v7, %v1578_v22  ;;  %v2229_v61 = vld [vmem:[#allocation6 + $0x30] sm:$0xff]  }
 0x327   :  { %v1590_v55 = vmul.f32 %v3535_v47, %v1578_v22  ;;  %v1591_v62 = vmul.f32 %v1578_v22, %v1462_v26  ;;  %v1592_v51 = vmul.f32 %v1578_v22, %v1465_v6  ;;  %v1593_v5 = vmul.f32 %v2154_v21, %v1578_v22  ;;  %2185 = vmatpush3.bf16.msra.mxu1 %v2227_v45 }
 0x328   :  { %v1570_v34 = vsub.f32 %v3342_v30, %v1566_v43  ;;  %v1594_v36 = vmul.f32 %v2155_v3, %v1578_v22  ;;  %v1627_v3 = vadd.f32 %v1626_v54, %v1625_v9  ;;  %2186 = vmatprep.subr.bf16.mxu1 %v2392_v50  ;;  %v2230_v22 = vld [vmem:[#allocation6 + $0x38] sm:$0xff]   ;;  %v3743_v9 = vld [vmem:[#allocation12_spill] sm:$0xff] }
 0x329   :  { %v3744_v43 = vsub.s32 7, %v3743_v9 }
 0x32a   :  { %v1602_v0 = vrot.slane %v1570_v34, %v3742_v39  ;;  %v1628_v20 = vrot.slane %v1627_v3, 2 }
 0x32b   :  { %2187 = vmatpush3.bf16.msra.mxu1 %v2228_v2 }
 0x32c   :  { %v3584_v17 = vadd.f32 %v1602_v0, %v1587_v35  ;;  %v3586_v42 = vadd.f32 %v1602_v0, %v1588_v57  ;;  %v3588_v28 = vadd.f32 %v1602_v0, %v1589_v11  ;;  %v3590_v37 = vadd.f32 %v1602_v0, %v1590_v55  ;;  %2188 = vmatprep.subr.bf16.mxu1 %v2392_v50 }
 0x32d   :  { %v3592_v7 = vadd.f32 %v1602_v0, %v1591_v62  ;;  %v3594_v47 = vadd.f32 %v1602_v0, %v1592_v51  ;;  %v3596_v26 = vadd.f32 %v1602_v0, %v1593_v5  ;;  %v3598_v21 = vadd.f32 %v1602_v0, %v1594_v36 }
 0x32e   :  { %v1632_v39 = vadd.f32 %v3586_v42, %v3584_v17  ;;  %v1629_v27 = vadd.f32 %v1628_v20, %v1627_v3  ;;  %v1668_v35 = vrot.slane %v3342_v30, %v3744_v43 }
 0x32f   :  { %2189 = vmatpush3.bf16.msra.mxu1 %v2229_v61 }
 0x330   :  { %v1633_v6 = vadd.f32 %v1632_v39, %v3588_v28  ;;  %v1630_v25 = vrot.slane %v1629_v27, 1  ;;  %2190 = vmatprep.subr.bf16.mxu1 %v2392_v50 }
 0x332   :  { %v1634_v38 = vadd.f32 %v1633_v6, %v3590_v37  ;;  %v1631_v60 = vadd.f32 %v1630_v25, %v1629_v27 }
 0x333   :  { %2191 = vmatpush3.bf16.msra.mxu1 %v2230_v22 }
 0x334   :  { %v1635_v59 = vadd.f32 %v1634_v38, %v3592_v7  ;;  %v1645_v52 = vmul.f32 0.015625, %v1631_v60  ;;  %v2053_v38 = vld [vmem:[#allocation3 + $0x10] ss:$0 sm:$0xff] }
 0x336   :  { %v1636_v41 = vadd.f32 %v1635_v59, %v3594_v47  ;;  %v1647_v16 = vpack.c.bf16 %v1645_v52, %v1645_v52 }
 0x338   :  { %v1637_v15 = vadd.f32 %v1636_v41, %v3596_v26  ;;  %v1671_v56 = vunpack.c.l.b16 %v1647_v16  ;;  %v3745_v16 = vld [vmem:[#allocation13_spill] sm:$0xff] }
 0x33a   :  { %v1638_v44 = vadd.f32 %v1637_v15, %v3598_v21 }
 0x33c   :  { %v1639_v4 = vrot.slane %v1638_v44, 4 }
 0x33e   :  { %v1640_v29 = vadd.f32 %v1639_v4, %v1638_v44  ;;  %v2394_v4 = vmov 1966171168  }
 0x340   :  { %v1641_v23 = vrot.slane %v1640_v29, 2 }
 0x342   :  { %v1642_v19 = vadd.f32 %v1641_v23, %v1640_v29  ;;  %v1890_v29 = vunpack.c.l.s4 %v2394_v4 }
 0x344   :  { %v1643_v46 = vrot.slane %v1642_v19, 1  ;;  %v1891_v60 = vunpack.c.0.s8 %v1890_v29 }
 0x346   :  { %v1644_v24 = vadd.f32 %v1643_v46, %v1642_v19  ;;  %v1894_v23 = vsub.s32 %v1891_v60, %v3743_v9 }
 0x348   :  { %v1646_v31 = vmul.f32 0.015625, %v1644_v24 }
 0x34a   :  { %v1648_v58 = vpack.c.bf16 %v1646_v31, %v1646_v31 }
 0x34c   :  { %v1672_v32 = vunpack.c.l.b16 %v1648_v58 }
 0x34e   :  { %v1674_v33 = vsel %vm1673_vm3, %v1672_v32, %v1671_v56 }
 0x34f   :  { %v1675_v12 = vpack.c.b16 %v1674_v33, %v1674_v33 }
 0x351   :  { %2173 = vmatmul.mubr.bf16.vlgmr.msra.gmra.mrb[16].mxu0 %v1675_v12 }
 0x424   :  { %v1759_v57 = vpop.f32.mrb[16].mxu0 }
 0x425   :  { %v1760_v11 = vadd.f32 %v1759_v57, %v1668_v35  ;;  %v2174_v55 = vpop.f32.mrb[17].mxu0 }
 0x426   :  { %v1762_v62 = vpop.f32.mrb[18].mxu0 }
 0x427   :  { %v1766_v51 = vmul.f32 0.035677407, %v1760_v11  ;;  %v2175_v5 = vpop.f32.mrb[19].mxu0  ;;  %v1765_v39 = vmul.f32 0.5, %v1760_v11 }
 0x429   :  { %v1767_v34 = vmul.f32 %v1766_v51, %v1760_v11 }
 0x42b   :  { %v1768_v36 = vadd.f32 0.7978846, %v1767_v34 }
 0x42d   :  { %v1769_v0 = vmul.f32 %v1768_v36, %v1760_v11 }
 0x42f   :  { %2307 = vtanh.f32 %v1769_v0 }
 0x439   :  { %v2308_v54 = vpop.eup %2307 }
 0x43a   :  { %v1771_v3 = vadd.f32 1.0, %v2308_v54 }
 0x43c   :  { %v1772_v6 = vmul.f32 %v1771_v3, %v1765_v39 }
 0x43e   :  { %v1773_v50 = vpack.c.bf16 %v1772_v6, %v1772_v6 }
 0x440   :  { %2193 = vmatmul.mubr.bf16.vlgmr.msra.gmra.mrb[16].mxu1 %v1773_v50 }
 0x513   :  { %v1876_v20 = vpop.f32.mrb[16].mxu1 }
 0x514   :  { %v1877_v59 = vadd.f32 %v2053_v38, %v1876_v20  ;;  %v2194_v30 = vpop.f32.mrb[17].mxu1 }
 0x515   :  { %v1879_v41 = vpop.f32.mrb[18].mxu1 }
 0x516   :  { %v2062_v27 = vmul.f32 -1.442695, %v1877_v59  ;;  %v2195_v15 = vpop.f32.mrb[19].mxu1 }
 0x518   :  { %2309 = vpow2.f32 %v2062_v27 }
 0x522   :  { %v2310_v44 = vpop.eup %2309 }
 0x523   :  { %v1885_v25 = vadd.f32 1.0, %v2310_v44 }
 0x525   :  { %2311 = vrcp.f32 %v1885_v25 }
 0x52f   :  { %v2312_v19 = vpop.eup %2311 }
 0x530   :  { %v1895_v46 = vrot.slane %v2312_v19, %v1894_v23 }
 0x532   :  { %v1896_v52 = vcombine.high %v1895_v46, %v1895_v46  ;;  %v1903_v24 = vrot.slane %v1895_v46, %v1894_v23 }
 0x534   :  { %v1910_v31 = vrot.slane %v1896_v52, %v1894_v23  ;;  %v1914_v58 = vrot.slane %v1903_v24, %v3745_v16 }
 0x536   :  { %v1918_v56 = vrot.slane %v1910_v31, %v3745_v16  ;;  %v1921_v32 = vmul.f32 %v1914_v58, %v3546_v49  ;;  %v1922_v12 = vmul.f32 %v1914_v58, %v3548_v63  ;;  %v1923_v13 = vmul.f32 %v1914_v58, %v3550_v18 }
 0x537   :  { %v1924_v45 = vmul.f32 %v1914_v58, %v3552_v48 }
 0x538   :  { %1937 = vxpose.xlu0.b32.start [1/8] (short) (narrow) %v1921_v32, 32  ;;  %v1929_v33 = vmul.f32 %v1918_v56, %v3584_v17  ;;  %v1930_v40 = vmul.f32 %v1918_v56, %v3586_v42  ;;  %v1931_v14 = vmul.f32 %v1918_v56, %v3588_v28  ;;  %v1932_v49 = vmul.f32 %v1918_v56, %v3590_v37 }
 0x539   :  { %v1925_v17 = vmul.f32 %v1914_v58, %v3554_v8  ;;  %v1933_v63 = vmul.f32 %v1918_v56, %v3592_v7  ;;  %v1926_v42 = vmul.f32 %v1914_v58, %v3556_v10  ;;  %v1934_v18 = vmul.f32 %v1918_v56, %v3594_v47 }
 0x53a   :  { %1974 = vxpose.xlu1.b32.start [1/8] (short) (narrow) %v1929_v33, 32  ;;  %v1927_v28 = vmul.f32 %v1914_v58, %v3558_v53  ;;  %v1935_v48 = vmul.f32 %v1918_v56, %v3596_v26  ;;  %v1928_v37 = vmul.f32 %v1914_v58, %v3560_v1  ;;  %v1936_v8 = vmul.f32 %v1918_v56, %v3598_v21 }
 0x53c   :  { %1938 = vxpose.xlu0.b32.cont [2/8] (short) (narrow) %v1922_v12, 32 }
 0x53e   :  { %1975 = vxpose.xlu1.b32.cont [2/8] (short) (narrow) %v1930_v40, 32 }
 0x540   :  { %1939 = vxpose.xlu0.b32.cont [3/8] (short) (narrow) %v1923_v13, 32 }
 0x542   :  { %1976 = vxpose.xlu1.b32.cont [3/8] (short) (narrow) %v1931_v14, 32 }
 0x544   :  { %1940 = vxpose.xlu0.b32.cont [4/8] (short) (narrow) %v1924_v45, 32 }
 0x546   :  { %1977 = vxpose.xlu1.b32.cont [4/8] (short) (narrow) %v1932_v49, 32 }
 0x548   :  { %1941 = vxpose.xlu0.b32.cont [5/8] (short) (narrow) %v1925_v17, 32 }
 0x54a   :  { %1978 = vxpose.xlu1.b32.cont [5/8] (short) (narrow) %v1933_v63, 32 }
 0x54c   :  { %1942 = vxpose.xlu0.b32.cont [6/8] (short) (narrow) %v1926_v42, 32 }
 0x54e   :  { %1979 = vxpose.xlu1.b32.cont [6/8] (short) (narrow) %v1934_v18, 32 }
 0x550   :  { %1943 = vxpose.xlu0.b32.cont [7/8] (short) (narrow) %v1927_v28, 32 }
 0x552   :  { %1980 = vxpose.xlu1.b32.cont [7/8] (short) (narrow) %v1935_v48, 32 }
 0x554   :  { %1944 = vxpose.xlu0.b32.end [8/8] (short) (narrow) %v1928_v37, 32 }
 0x556   :  { %1981 = vxpose.xlu1.b32.end [8/8] (short) (narrow) %v1936_v8, 32 }
 0x5b8   :  { %v1953_v7 = vpop.trf.xlu0 }
 0x5b9   :  { %1970 = vst.msk [vmem:[#allocation8] sm:$0xff] %vm1969_vm4, %v1953_v7 }
 0x5ba   :  { %v1990_v10 = vpop.trf.xlu1 }
 0x5bb   :  { %2007 = vst.msk [vmem:[#allocation8 + $0x20] sm:$0xff] %vm1969_vm4, %v1990_v10 }
 0x5bc   :  { %v1954_v47 = vpop.trf.xlu0 }
 0x5bd   :  { %1971 = vst.msk [vmem:[#allocation8 + $0x8] sm:$0xff] %vm1969_vm4, %v1954_v47 }
 0x5be   :  { %v1991_v53 = vpop.trf.xlu1 }
 0x5bf   :  { %2008 = vst.msk [vmem:[#allocation8 + $0x28] sm:$0xff] %vm1969_vm4, %v1991_v53 }
 0x5c0   :  { %v1955_v26 = vpop.trf.xlu0 }
 0x5c1   :  { %1972 = vst.msk [vmem:[#allocation8 + $0x10] sm:$0xff] %vm1969_vm4, %v1955_v26 }
 0x5c2   :  { %v1992_v1 = vpop.trf.xlu1 }
 0x5c3   :  { %2009 = vst.msk [vmem:[#allocation8 + $0x30] sm:$0xff] %vm1969_vm4, %v1992_v1 }
 0x5c4   :  { %v1956_v21 = vpop.trf.xlu0 }
 0x5c5   :  { %1973 = vst.msk [vmem:[#allocation8 + $0x18] sm:$0xff] %vm1969_vm4, %v1956_v21 }
 0x5c6   :  { %v1993_v2 = vpop.trf.xlu1 }
 0x5c7   :  { %2010 = vst.msk [vmem:[#allocation8 + $0x38] sm:$0xff] %vm1969_vm4, %v1993_v2 }
 0x5c8   :  { %2369 = shalt.err (!%p2366_p6)
}
 0x5c9   :  { %s2370_s17 = scalar_lea.hbm %s3665_s6, 1024 }
 0x5ca   :  { %p2371_p7 = scmp.ne.s32.totalorder %s3665_s6, %s2370_s17  ;;  %p2374_p8 = scmp.lt.u32.totalorder %s2370_s17, %s3665_s6 }
 0x5cc   :  { %p2376_p9 = pnand %p2374_p8, %p2371_p7 }
 0x5ce   :  { %2379 = shalt.err (!%p2376_p9)
}
 0x5cf   :  { %2022 = dma.vmem_to_hbm [thread:$0]  %s2017_s13, 1024, %s3665_s6, [#allocation5], %s2387_s7, %s2387_s7, %s2388_s8  }
 0x5d0   :  { %2384 = dma.done.wait [#allocation5], 1024  }
 0x5d1   :  { %2385 = vsyncadd [#allocation5], 4294966272 }
 0x5d2   :  { %2026 = vsyncpa [#allocation4], 1 }
 0x5d3   :  { %2027 = vsyncpa [#allocation7], 1 }
 0x5d4   :  { %2028 = vsyncpa [#allocation5], 1 }

</bundles_post_ra>
